<compile_context>
chip_gen: v7x
topology: tpu7x:2x2x1
jax: 0.10.0
libtpu: 0.0.40
codegen_flags: <defaults>
</compile_context>

<pallas_src>
import functools

import jax
import jax.numpy as jnp
from jax import lax
from jax.experimental import pallas as pl
from jax.experimental.pallas import tpu as pltpu


def _round_up(x, m):
    return ((x + m - 1) // m) * m


def _pick_batch_tile(Bp):
    # Split the padded batch into multiple tiles when it is large (the batch
    # grid axis is "parallel", so v7x's 2 TensorCores each take tiles); keep
    # each tile a multiple of 16 rows so per-step bf16 stores stay unmasked.
    if Bp > 128 and Bp % 128 == 0:
        return 128
    return Bp


def _pick_time_chunk(T, Bt, Ep, Hp, budget_bytes=24 << 20):
    # Largest divisor of T whose chunk-dependent VMEM working set (double-
    # buffered x/out blocks + per-chunk f32 gates_x scratch) fits a budget that
    # is conservative for v7x (64 MiB physical / 32 MiB default scoped VMEM).
    # Prefer >= 2 chunks so the next chunk's x DMA overlaps this chunk's
    # recurrence (pipelining).
    def chunk_bytes(tc):
        return (2 * tc * Bt * Ep * 2        # x block, double-buffered, bf16
                + 2 * tc * Bt * Hp * 2      # out block, double-buffered, bf16
                + tc * Bt * 4 * Hp * 4)     # per-chunk gates_x scratch, f32

    max_tc = T if T == 1 else T // 2
    best = 1
    for tc in range(1, max_tc + 1):
        if T % tc == 0 and chunk_bytes(tc) <= budget_bytes:
            best = tc
    return best


def _vmem_limit_bytes(estimate):
    # Explicit scoped-VMEM limit with ~50% headroom; floor at the 32 MiB
    # default, cap below v7x's 64 MiB physical VMEM.
    return int(min(max(estimate * 3 // 2, 32 << 20), 64 << 20))


# ---------------------------------------------------------------------------
# Shared recurrent step.  PyTorch gate order [i, f, g, o]; each gate occupies
# a 128-aligned lane chunk of width Hp (padded), so slices are lane-aligned.
# Padded gate lanes stay inert: c_pad, h_pad remain exactly 0 because the pad
# columns of W_ih/W_hh/b are zero and c starts at 0.
# ---------------------------------------------------------------------------
def _lstm_step(gx, h, c, w_hh_ref, hp):
    # TODO(synk): on v5e, hold W_hh in MXU weight staging across timesteps via
    # pltpu.matmul_push_rhs/matmul_acc_lhs/matmul_pop to avoid per-step weight
    # reload; for tiny batches, interleave two independent batch halves to
    # hide the serial MXU->EUP->VPU chain.
    gates = gx + jnp.dot(h.astype(w_hh_ref.dtype), w_hh_ref[...],
                         preferred_element_type=jnp.float32)
    i_g = jax.nn.sigmoid(gates[:, 0 * hp:1 * hp])
    f_g = jax.nn.sigmoid(gates[:, 1 * hp:2 * hp])
    g_g = jnp.tanh(gates[:, 2 * hp:3 * hp])
    o_g = jax.nn.sigmoid(gates[:, 3 * hp:4 * hp])
    c_new = f_g * c + i_g * g_g
    h_new = o_g * jnp.tanh(c_new)
    return h_new, c_new


# ---------------------------------------------------------------------------
# Non-top LSTM layer: emits the full hidden sequence (T, Bp, Hp) in bf16.
# Grid = (batch_tiles, time_chunks); h/c persist across time chunks.
# ---------------------------------------------------------------------------
def _lstm_seq_kernel(x_ref, w_ih_ref, w_hh_ref, b_ref, out_ref,
                     h_sc, c_sc, gx_sc, *, Tc, Bt):
    hp = h_sc.shape[-1]
    ep = x_ref.shape[-1]

    @pl.when(pl.program_id(1) == 0)
    def _():
        h_sc[...] = jnp.zeros_like(h_sc)
        c_sc[...] = jnp.zeros_like(c_sc)

    # Per-chunk hoisted input projection: one MXU matmul over Tc*Bt rows.
    x2 = x_ref[...].reshape(Tc * Bt, ep)
    gx_sc[...] = (jnp.dot(x2, w_ih_ref[...],
                          preferred_element_type=jnp.float32) + b_ref[...])

    def step(k, carry):
        r = pl.multiple_of(k * Bt, Bt)               # sublane-aligned row slab
        gx = gx_sc[pl.ds(r, Bt), :]
        h_new, c_new = _lstm_step(gx, h_sc[...], c_sc[...], w_hh_ref, hp)
        h_sc[...] = h_new
        c_sc[...] = c_new
        # Direct lane-dense bf16 store of this step's hidden state (Bt is a
        # multiple of 16, so the store is full-sublane / unmasked).
        out_ref[k] = h_new.astype(out_ref.dtype)
        return carry

    lax.fori_loop(0, Tc, step, 0, unroll=min(Tc, 4))


# ---------------------------------------------------------------------------
# Top LSTM layer with fused classifier head: emits only (Bp, Cp) logits.
# ---------------------------------------------------------------------------
def _lstm_head_kernel(x_ref, w_ih_ref, w_hh_ref, b_ref, fc_w_ref, fc_b_ref,
                      out_ref, h_sc, c_sc, gx_sc, *, Tc, Bt):
    hp = h_sc.shape[-1]
    ep = x_ref.shape[-1]

    @pl.when(pl.program_id(1) == 0)
    def _():
        h_sc[...] = jnp.zeros_like(h_sc)
        c_sc[...] = jnp.zeros_like(c_sc)

    x2 = x_ref[...].reshape(Tc * Bt, ep)
    gx_sc[...] = (jnp.dot(x2, w_ih_ref[...],
                          preferred_element_type=jnp.float32) + b_ref[...])

    def step(k, carry):
        r = pl.multiple_of(k * Bt, Bt)
        gx = gx_sc[pl.ds(r, Bt), :]
        h_new, c_new = _lstm_step(gx, h_sc[...], c_sc[...], w_hh_ref, hp)
        h_sc[...] = h_new
        c_sc[...] = c_new
        return carry

    lax.fori_loop(0, Tc, step, 0, unroll=min(Tc, 4))

    # Fused head on hidden[-1]; write once on the last time chunk (the output
    # block is time-invariant, so it only flushes to HBM after this chunk).
    # Eval-mode dropout is identity.
    @pl.when(pl.program_id(1) == pl.num_programs(1) - 1)
    def _():
        out_ref[...] = (jnp.dot(h_sc[...].astype(fc_w_ref.dtype), fc_w_ref[...],
                                preferred_element_type=jnp.float32)
                        + fc_b_ref[...])


# ---------------------------------------------------------------------------
# pallas_call wrappers: 2-D grid (batch tile [parallel], time chunk [arbitrary]).
# ---------------------------------------------------------------------------
def lstm_seq_layer(x, w_ih, w_hh, b, *, Tc, Bt):
    T, Bp, Ep = x.shape
    Hp = w_hh.shape[0]
    n_b, n_t = Bp // Bt, T // Tc
    kernel = functools.partial(_lstm_seq_kernel, Tc=Tc, Bt=Bt)
    vmem_est = (2 * Tc * Bt * Ep * 2                 # x blocks (bf16, x2 bufs)
                + 2 * Tc * Bt * Hp * 2               # out blocks (bf16, x2)
                + 2 * (Ep * 4 * Hp * 2 + Hp * 4 * Hp * 2 + 4 * Hp * 4)  # weights
                + 2 * Bt * Hp * 4                    # h, c scratch
                + Tc * Bt * 4 * Hp * 4)              # per-chunk gates_x scratch
    # TODO(synk): weight blocks are grid-invariant; pipeline_mode=pl.Buffered(1)
    # on them would drop their second buffer (matters at realistic Ep/Hp).
    return pl.pallas_call(
        kernel,
        out_shape=jax.ShapeDtypeStruct((T, Bp, Hp), jnp.bfloat16),
        grid_spec=pltpu.PrefetchScalarGridSpec(
            num_scalar_prefetch=0,
            grid=(n_b, n_t),
            in_specs=[
                pl.BlockSpec((Tc, Bt, Ep), lambda bi, ti: (ti, bi, 0)),
                pl.BlockSpec((Ep, 4 * Hp), lambda bi, ti: (0, 0)),
                pl.BlockSpec((Hp, 4 * Hp), lambda bi, ti: (0, 0)),
                pl.BlockSpec((1, 4 * Hp), lambda bi, ti: (0, 0)),
            ],
            out_specs=pl.BlockSpec((Tc, Bt, Hp), lambda bi, ti: (ti, bi, 0)),
            scratch_shapes=[
                pltpu.VMEM((Bt, Hp), jnp.float32),           # h state
                pltpu.VMEM((Bt, Hp), jnp.float32),           # c state
                pltpu.VMEM((Tc * Bt, 4 * Hp), jnp.float32),  # per-chunk gates_x
            ],
        ),
        compiler_params=pltpu.CompilerParams(
            dimension_semantics=("parallel", "arbitrary"),
            vmem_limit_bytes=_vmem_limit_bytes(vmem_est)),
    )(x, w_ih, w_hh, b)


def lstm_head_layer(x, w_ih, w_hh, b, fc_w, fc_b, *, Tc, Bt):
    T, Bp, Ep = x.shape
    Hp = w_hh.shape[0]
    Cp = fc_w.shape[1]
    n_b, n_t = Bp // Bt, T // Tc
    kernel = functools.partial(_lstm_head_kernel, Tc=Tc, Bt=Bt)
    vmem_est = (2 * Tc * Bt * Ep * 2
                + 2 * Bt * Cp * 4
                + 2 * (Ep * 4 * Hp * 2 + Hp * 4 * Hp * 2 + 4 * Hp * 4
                       + Hp * Cp * 2 + Cp * 4)
                + 2 * Bt * Hp * 4
                + Tc * Bt * 4 * Hp * 4)
    return pl.pallas_call(
        kernel,
        out_shape=jax.ShapeDtypeStruct((Bp, Cp), jnp.float32),
        grid_spec=pltpu.PrefetchScalarGridSpec(
            num_scalar_prefetch=0,
            grid=(n_b, n_t),
            in_specs=[
                pl.BlockSpec((Tc, Bt, Ep), lambda bi, ti: (ti, bi, 0)),
                pl.BlockSpec((Ep, 4 * Hp), lambda bi, ti: (0, 0)),
                pl.BlockSpec((Hp, 4 * Hp), lambda bi, ti: (0, 0)),
                pl.BlockSpec((1, 4 * Hp), lambda bi, ti: (0, 0)),
                pl.BlockSpec((Hp, Cp), lambda bi, ti: (0, 0)),
                pl.BlockSpec((1, Cp), lambda bi, ti: (0, 0)),
            ],
            out_specs=pl.BlockSpec((Bt, Cp), lambda bi, ti: (bi, 0)),
            scratch_shapes=[
                pltpu.VMEM((Bt, Hp), jnp.float32),
                pltpu.VMEM((Bt, Hp), jnp.float32),
                pltpu.VMEM((Tc * Bt, 4 * Hp), jnp.float32),
            ],
        ),
        compiler_params=pltpu.CompilerParams(
            dimension_semantics=("parallel", "arbitrary"),
            vmem_limit_bytes=_vmem_limit_bytes(vmem_est)),
    )(x, w_ih, w_hh, b, fc_w, fc_b)


# ---------------------------------------------------------------------------
# Parameter prep: pad per-gate to Hp lanes, pad contraction dims, cast weights
# to bf16 (biases stay f32; added after the f32-accumulated matmul).
# ---------------------------------------------------------------------------
def _pad_gate_cols(w, H, Hp):
    parts = []
    for k in range(4):
        g = w[..., k * H:(k + 1) * H]
        pad = [(0, 0)] * (g.ndim - 1) + [(0, Hp - H)]
        parts.append(jnp.pad(g, pad))
    return jnp.concatenate(parts, axis=-1)


def prepare_params(params, embedding_dim, hidden_dim, num_classes):
    Ep = _round_up(embedding_dim, 128)
    Hp = _round_up(hidden_dim, 128)
    Cp = _round_up(num_classes, 128)
    prepped = {
        "embedding": jnp.pad(params["embedding"],
                             ((0, 0), (0, Ep - embedding_dim))),
        "lstm": [],
        "dims": (Ep, Hp, Cp),
    }
    in_dim, in_pad = embedding_dim, Ep
    for layer in params["lstm"]:
        w_ih = _pad_gate_cols(layer["w_ih"], hidden_dim, Hp)
        w_ih = jnp.pad(w_ih, ((0, in_pad - in_dim), (0, 0))).astype(jnp.bfloat16)
        w_hh = _pad_gate_cols(layer["w_hh"], hidden_dim, Hp)
        w_hh = jnp.pad(w_hh, ((0, Hp - hidden_dim), (0, 0))).astype(jnp.bfloat16)
        b = _pad_gate_cols(layer["b"], hidden_dim, Hp)  # f32
        prepped["lstm"].append({"w_ih": w_ih, "w_hh": w_hh, "b": b})
        in_dim, in_pad = hidden_dim, Hp
    fc_w = jnp.pad(params["fc_w"],
                   ((0, Hp - hidden_dim), (0, Cp - num_classes)))
    prepped["fc_w"] = fc_w.astype(jnp.bfloat16)
    prepped["fc_b"] = jnp.pad(params["fc_b"], ((0, 0), (0, Cp - num_classes)))
    return prepped


# ---------------------------------------------------------------------------
# Full forward pass (eval mode: dropout = identity).
# ---------------------------------------------------------------------------
def lstm_text_classifier_forward(input_ids, prepped, num_classes):
    Ep, Hp, Cp = prepped["dims"]
    B, T = input_ids.shape
    Bp = _round_up(max(B, 16), 16)       # 16-row multiple: full-sublane bf16 stores
    Bt = _pick_batch_tile(Bp)
    Tc = _pick_time_chunk(T, Bt, Ep, Hp)

    # Embedding lookup (data-dependent gather) — plain JAX glue.
    emb = jnp.take(prepped["embedding"], input_ids, axis=0)        # (B, T, Ep)
    emb = jnp.pad(emb, ((0, Bp - B), (0, 0), (0, 0)))              # (Bp, T, Ep)
    # Time-major 3-D layout so (Tc, Bt) time/batch blocks tile cleanly.
    x = jnp.transpose(emb, (1, 0, 2)).astype(jnp.bfloat16)         # (T, Bp, Ep)

    layers = prepped["lstm"]
    for layer in layers[:-1]:
        x = lstm_seq_layer(x, layer["w_ih"], layer["w_hh"], layer["b"],
                           Tc=Tc, Bt=Bt)
        # TODO(synk): inter-layer LSTM dropout and nn.Dropout are identity
        # (deterministic eval-mode inference).
    # TODO(synk): on v6e (128 MiB VMEM) the whole layer stack could be fused in
    # one kernel so the intermediate (T, Bp, Hp) sequence never hits HBM.

    top = layers[-1]
    logits_p = lstm_head_layer(x, top["w_ih"], top["w_hh"], top["b"],
                               prepped["fc_w"], prepped["fc_b"], Tc=Tc, Bt=Bt)
    return logits_p[:B, :num_classes]


# ---------------------------------------------------------------------------
# Deterministic parameter init (logical shapes match the PyTorch module).
# ---------------------------------------------------------------------------
def init_params(key, vocab_size, embedding_dim, hidden_dim, num_layers,
                num_classes):
    keys = jax.random.split(key, 2 + 4 * num_layers + 2)
    k_iter = iter(keys)
    scale = 1.0 / jnp.sqrt(hidden_dim)

    params = {
        "embedding": jax.random.normal(
            next(k_iter), (vocab_size, embedding_dim), jnp.float32),
        "lstm": [],
    }
    in_dim = embedding_dim
    for _ in range(num_layers):
        w_ih = jax.random.uniform(
            next(k_iter), (in_dim, 4 * hidden_dim), jnp.float32, -scale, scale)
        w_hh = jax.random.uniform(
            next(k_iter), (hidden_dim, 4 * hidden_dim), jnp.float32, -scale, scale)
        b_ih = jax.random.uniform(
            next(k_iter), (1, 4 * hidden_dim), jnp.float32, -scale, scale)
        b_hh = jax.random.uniform(
            next(k_iter), (1, 4 * hidden_dim), jnp.float32, -scale, scale)
        params["lstm"].append({"w_ih": w_ih, "w_hh": w_hh, "b": b_ih + b_hh})
        in_dim = hidden_dim

    params["fc_w"] = jax.random.uniform(
        next(k_iter), (hidden_dim, num_classes), jnp.float32, -scale, scale)
    params["fc_b"] = jax.random.uniform(
        next(k_iter), (1, num_classes), jnp.float32, -scale, scale)
    return params


if __name__ == "__main__":
    VOCAB, EMB, HID, LAYERS, CLASSES = 50, 16, 32, 2, 4
    B, T = 2, 8

    key = jax.random.PRNGKey(0)
    pkey, dkey = jax.random.split(key)
    params = init_params(pkey, VOCAB, EMB, HID, LAYERS, CLASSES)
    prepped = prepare_params(params, EMB, HID, CLASSES)
    input_ids = jax.random.randint(dkey, (B, T), 0, VOCAB, dtype=jnp.int32)

    logits = lstm_text_classifier_forward(input_ids, prepped, CLASSES)
    jax.block_until_ready(logits)
    assert logits.shape == (B, CLASSES)
    assert bool(jnp.all(jnp.isfinite(logits)))
    print("KERNEL_OK")
</pallas_src>

<mosaic_0001>
module attributes {stable_mosaic.version = 11 : i64} {
  func.func @_lstm_seq_kernel(%arg0: i32, %arg1: i32, %arg2: memref<4x16x128xbf16, #tpu.memory_space<vmem>>, %arg3: memref<128x512xbf16, #tpu.memory_space<vmem>>, %arg4: memref<128x512xbf16, #tpu.memory_space<vmem>>, %arg5: memref<1x512xf32, #tpu.memory_space<vmem>>, %arg6: memref<4x16x128xbf16, #tpu.memory_space<vmem>>, %arg7: memref<16x128xf32, #tpu.memory_space<vmem>>, %arg8: memref<16x128xf32, #tpu.memory_space<vmem>>, %arg9: memref<64x512xf32, #tpu.memory_space<vmem>>) attributes {dimension_semantics = [#tpu.dimension_semantics<parallel>, #tpu.dimension_semantics<arbitrary>], iteration_bounds = array<i64: 1, 2>, scalar_prefetch = 0 : i64, scratch_operands = 3 : i64, tpu.core_type = #tpu.core_type<tc>, window_params = [{transform_indices = @transform_0, window_bounds = array<i64: 4, 16, 128>}, {pipeline_mode = #tpu.pipeline_mode<synchronous>, transform_indices = @transform_1, window_bounds = array<i64: 128, 512>}, {pipeline_mode = #tpu.pipeline_mode<synchronous>, transform_indices = @transform_2, window_bounds = array<i64: 128, 512>}, {pipeline_mode = #tpu.pipeline_mode<synchronous>, transform_indices = @transform_3, window_bounds = array<i64: 1, 512>}, {transform_indices = @transform_4, window_bounds = array<i64: 4, 16, 128>}]} {
    %c0_i32 = arith.constant 0 : i32
    %0 = arith.cmpi eq, %arg1, %c0_i32 : i32
    %1 = arith.extui %0 : i1 to i32
    %c0_i32_0 = arith.constant 0 : i32
    %2 = arith.cmpi ne, %1, %c0_i32_0 : i32
    scf.if %2 {
      %cst_81 = arith.constant 0.000000e+00 : f32
      %179 = vector.broadcast %cst_81 : f32 to vector<16x128xf32>
      %c0_82 = arith.constant 0 : index
      %c0_83 = arith.constant 0 : index
      %180 = vector.load %arg7[%c0_82, %c0_83] : memref<16x128xf32, #tpu.memory_space<vmem>>, vector<16x128xf32>
      tpu.vector_store %arg7[%c0_82, %c0_83], %179 {strides = array<i32>} : memref<16x128xf32, #tpu.memory_space<vmem>>, vector<16x128xf32>,
      %cst_84 = arith.constant 0.000000e+00 : f32
      %181 = vector.broadcast %cst_84 : f32 to vector<16x128xf32>
      %c0_85 = arith.constant 0 : index
      %c0_86 = arith.constant 0 : index
      %182 = vector.load %arg8[%c0_85, %c0_86] : memref<16x128xf32, #tpu.memory_space<vmem>>, vector<16x128xf32>
      tpu.vector_store %arg8[%c0_85, %c0_86], %181 {strides = array<i32>} : memref<16x128xf32, #tpu.memory_space<vmem>>, vector<16x128xf32>,
    } else {
    }
    %c0 = arith.constant 0 : index
    %c0_1 = arith.constant 0 : index
    %c0_2 = arith.constant 0 : index
    %3 = vector.load %arg2[%c0, %c0_1, %c0_2] : memref<4x16x128xbf16, #tpu.memory_space<vmem>>, vector<4x16x128xbf16>
    %4 = vector.shape_cast %3 : vector<4x16x128xbf16> to vector<64x128xbf16>
    %c0_3 = arith.constant 0 : index
    %c0_4 = arith.constant 0 : index
    %5 = vector.load %arg3[%c0_3, %c0_4] : memref<128x512xbf16, #tpu.memory_space<vmem>>, vector<128x512xbf16>
    %cst = arith.constant dense<0.000000e+00> : vector<64x512xf32>
    %6 = tpu.matmul %4, %5, %cst {dimension_numbers = #tpu.dot_dimension_numbers<[1], [0], [0], [1], [0, 0, 1, 1], [], []>} : vector<64x128xbf16>, vector<128x512xbf16>, vector<64x512xf32> -> vector<64x512xf32>
    %c0_5 = arith.constant 0 : index
    %c0_6 = arith.constant 0 : index
    %7 = vector.load %arg5[%c0_5, %c0_6] : memref<1x512xf32, #tpu.memory_space<vmem>>, vector<1x512xf32>
    %8 = vector.broadcast %7 : vector<1x512xf32> to vector<64x512xf32>
    %9 = arith.addf %6, %8 : vector<64x512xf32>
    %c0_7 = arith.constant 0 : index
    %c0_8 = arith.constant 0 : index
    %10 = vector.load %arg9[%c0_7, %c0_8] : memref<64x512xf32, #tpu.memory_space<vmem>>, vector<64x512xf32>
    tpu.vector_store %arg9[%c0_7, %c0_8], %9 {strides = array<i32>} : memref<64x512xf32, #tpu.memory_space<vmem>>, vector<64x512xf32>,
    %c0_i32_9 = arith.constant 0 : i32
    %c16_i32 = arith.constant 16 : i32
    %11 = arith.muli %c0_i32_9, %c16_i32 : i32
    %12 = tpu.assume_multiple %11, 16 : i32
    %13 = arith.index_cast %12 : i32 to index
    %c0_10 = arith.constant 0 : index
    %14 = vector.load %arg9[%13, %c0_10] : memref<64x512xf32, #tpu.memory_space<vmem>>, vector<16x512xf32>
    %c0_11 = arith.constant 0 : index
    %c0_12 = arith.constant 0 : index
    %15 = vector.load %arg7[%c0_11, %c0_12] : memref<16x128xf32, #tpu.memory_space<vmem>>, vector<16x128xf32>
    %c0_13 = arith.constant 0 : index
    %c0_14 = arith.constant 0 : index
    %16 = vector.load %arg8[%c0_13, %c0_14] : memref<16x128xf32, #tpu.memory_space<vmem>>, vector<16x128xf32>
    %17 = arith.truncf %15 : vector<16x128xf32> to vector<16x128xbf16>
    %c0_15 = arith.constant 0 : index
    %c0_16 = arith.constant 0 : index
    %18 = vector.load %arg4[%c0_15, %c0_16] : memref<128x512xbf16, #tpu.memory_space<vmem>>, vector<128x512xbf16>
    %cst_17 = arith.constant dense<0.000000e+00> : vector<16x512xf32>
    %19 = tpu.matmul %17, %18, %cst_17 {dimension_numbers = #tpu.dot_dimension_numbers<[1], [0], [0], [1], [0, 0, 1, 1], [], []>} : vector<16x128xbf16>, vector<128x512xbf16>, vector<16x512xf32> -> vector<16x512xf32>
    %20 = arith.addf %14, %19 : vector<16x512xf32>
    %21 = vector.extract_strided_slice %20 {offsets = [0, 0], sizes = [16, 128], strides = [1, 1]} : vector<16x512xf32> to vector<16x128xf32>
    %22 = arith.negf %21 : vector<16x128xf32>
    %23 = math.exp %22 : vector<16x128xf32>
    %cst_18 = arith.constant 1.000000e+00 : f32
    %24 = vector.broadcast %cst_18 : f32 to vector<16x128xf32>
    %25 = arith.addf %24, %23 : vector<16x128xf32>
    %26 = arith.divf %24, %25 : vector<16x128xf32>
    %27 = vector.extract_strided_slice %20 {offsets = [0, 128], sizes = [16, 128], strides = [1, 1]} : vector<16x512xf32> to vector<16x128xf32>
    %28 = arith.negf %27 : vector<16x128xf32>
    %29 = math.exp %28 : vector<16x128xf32>
    %cst_19 = arith.constant 1.000000e+00 : f32
    %30 = vector.broadcast %cst_19 : f32 to vector<16x128xf32>
    %31 = arith.addf %30, %29 : vector<16x128xf32>
    %32 = arith.divf %30, %31 : vector<16x128xf32>
    %33 = vector.extract_strided_slice %20 {offsets = [0, 256], sizes = [16, 128], strides = [1, 1]} : vector<16x512xf32> to vector<16x128xf32>
    %34 = math.tanh %33 : vector<16x128xf32>
    %35 = vector.extract_strided_slice %20 {offsets = [0, 384], sizes = [16, 128], strides = [1, 1]} : vector<16x512xf32> to vector<16x128xf32>
    %36 = arith.negf %35 : vector<16x128xf32>
    %37 = math.exp %36 : vector<16x128xf32>
    %cst_20 = arith.constant 1.000000e+00 : f32
    %38 = vector.broadcast %cst_20 : f32 to vector<16x128xf32>
    %39 = arith.addf %38, %37 : vector<16x128xf32>
    %40 = arith.divf %38, %39 : vector<16x128xf32>
    %41 = arith.mulf %32, %16 : vector<16x128xf32>
    %42 = arith.mulf %26, %34 : vector<16x128xf32>
    %43 = arith.addf %41, %42 : vector<16x128xf32>
    %44 = math.tanh %43 : vector<16x128xf32>
    %45 = arith.mulf %40, %44 : vector<16x128xf32>
    %c0_21 = arith.constant 0 : index
    %c0_22 = arith.constant 0 : index
    %46 = vector.load %arg7[%c0_21, %c0_22] : memref<16x128xf32, #tpu.memory_space<vmem>>, vector<16x128xf32>
    tpu.vector_store %arg7[%c0_21, %c0_22], %45 {strides = array<i32>} : memref<16x128xf32, #tpu.memory_space<vmem>>, vector<16x128xf32>,
    %c0_23 = arith.constant 0 : index
    %c0_24 = arith.constant 0 : index
    %47 = vector.load %arg8[%c0_23, %c0_24] : memref<16x128xf32, #tpu.memory_space<vmem>>, vector<16x128xf32>
    tpu.vector_store %arg8[%c0_23, %c0_24], %43 {strides = array<i32>} : memref<16x128xf32, #tpu.memory_space<vmem>>, vector<16x128xf32>,
    %48 = arith.truncf %45 : vector<16x128xf32> to vector<16x128xbf16>
    %49 = arith.index_cast %c0_i32_9 : i32 to index
    %c0_25 = arith.constant 0 : index
    %c0_26 = arith.constant 0 : index
    %50 = vector.load %arg6[%49, %c0_25, %c0_26] : memref<4x16x128xbf16, #tpu.memory_space<vmem>>, vector<1x16x128xbf16>
    %51 = vector.shape_cast %50 : vector<1x16x128xbf16> to vector<16x128xbf16>
    %52 = vector.shape_cast %48 : vector<16x128xbf16> to vector<1x16x128xbf16>
    tpu.vector_store %arg6[%49, %c0_25, %c0_26], %52 {strides = array<i32>} : memref<4x16x128xbf16, #tpu.memory_space<vmem>>, vector<1x16x128xbf16>,
    %c1_i32 = arith.constant 1 : i32
    %c16_i32_27 = arith.constant 16 : i32
    %53 = arith.muli %c1_i32, %c16_i32_27 : i32
    %54 = tpu.assume_multiple %53, 16 : i32
    %55 = arith.index_cast %54 : i32 to index
    %c0_28 = arith.constant 0 : index
    %56 = vector.load %arg9[%55, %c0_28] : memref<64x512xf32, #tpu.memory_space<vmem>>, vector<16x512xf32>
    %c0_29 = arith.constant 0 : index
    %c0_30 = arith.constant 0 : index
    %57 = vector.load %arg7[%c0_29, %c0_30] : memref<16x128xf32, #tpu.memory_space<vmem>>, vector<16x128xf32>
    %c0_31 = arith.constant 0 : index
    %c0_32 = arith.constant 0 : index
    %58 = vector.load %arg8[%c0_31, %c0_32] : memref<16x128xf32, #tpu.memory_space<vmem>>, vector<16x128xf32>
    %59 = arith.truncf %57 : vector<16x128xf32> to vector<16x128xbf16>
    %c0_33 = arith.constant 0 : index
    %c0_34 = arith.constant 0 : index
    %60 = vector.load %arg4[%c0_33, %c0_34] : memref<128x512xbf16, #tpu.memory_space<vmem>>, vector<128x512xbf16>
    %cst_35 = arith.constant dense<0.000000e+00> : vector<16x512xf32>
    %61 = tpu.matmul %59, %60, %cst_35 {dimension_numbers = #tpu.dot_dimension_numbers<[1], [0], [0], [1], [0, 0, 1, 1], [], []>} : vector<16x128xbf16>, vector<128x512xbf16>, vector<16x512xf32> -> vector<16x512xf32>
    %62 = arith.addf %56, %61 : vector<16x512xf32>
    %63 = vector.extract_strided_slice %62 {offsets = [0, 0], sizes = [16, 128], strides = [1, 1]} : vector<16x512xf32> to vector<16x128xf32>
    %64 = arith.negf %63 : vector<16x128xf32>
    %65 = math.exp %64 : vector<16x128xf32>
    %cst_36 = arith.constant 1.000000e+00 : f32
    %66 = vector.broadcast %cst_36 : f32 to vector<16x128xf32>
    %67 = arith.addf %66, %65 : vector<16x128xf32>
    %68 = arith.divf %66, %67 : vector<16x128xf32>
    %69 = vector.extract_strided_slice %62 {offsets = [0, 128], sizes = [16, 128], strides = [1, 1]} : vector<16x512xf32> to vector<16x128xf32>
    %70 = arith.negf %69 : vector<16x128xf32>
    %71 = math.exp %70 : vector<16x128xf32>
    %cst_37 = arith.constant 1.000000e+00 : f32
    %72 = vector.broadcast %cst_37 : f32 to vector<16x128xf32>
    %73 = arith.addf %72, %71 : vector<16x128xf32>
    %74 = arith.divf %72, %73 : vector<16x128xf32>
    %75 = vector.extract_strided_slice %62 {offsets = [0, 256], sizes = [16, 128], strides = [1, 1]} : vector<16x512xf32> to vector<16x128xf32>
    %76 = math.tanh %75 : vector<16x128xf32>
    %77 = vector.extract_strided_slice %62 {offsets = [0, 384], sizes = [16, 128], strides = [1, 1]} : vector<16x512xf32> to vector<16x128xf32>
    %78 = arith.negf %77 : vector<16x128xf32>
    %79 = math.exp %78 : vector<16x128xf32>
    %cst_38 = arith.constant 1.000000e+00 : f32
    %80 = vector.broadcast %cst_38 : f32 to vector<16x128xf32>
    %81 = arith.addf %80, %79 : vector<16x128xf32>
    %82 = arith.divf %80, %81 : vector<16x128xf32>
    %83 = arith.mulf %74, %58 : vector<16x128xf32>
    %84 = arith.mulf %68, %76 : vector<16x128xf32>
    %85 = arith.addf %83, %84 : vector<16x128xf32>
    %86 = math.tanh %85 : vector<16x128xf32>
    %87 = arith.mulf %82, %86 : vector<16x128xf32>
    %c0_39 = arith.constant 0 : index
    %c0_40 = arith.constant 0 : index
    %88 = vector.load %arg7[%c0_39, %c0_40] : memref<16x128xf32, #tpu.memory_space<vmem>>, vector<16x128xf32>
    tpu.vector_store %arg7[%c0_39, %c0_40], %87 {strides = array<i32>} : memref<16x128xf32, #tpu.memory_space<vmem>>, vector<16x128xf32>,
    %c0_41 = arith.constant 0 : index
    %c0_42 = arith.constant 0 : index
    %89 = vector.load %arg8[%c0_41, %c0_42] : memref<16x128xf32, #tpu.memory_space<vmem>>, vector<16x128xf32>
    tpu.vector_store %arg8[%c0_41, %c0_42], %85 {strides = array<i32>} : memref<16x128xf32, #tpu.memory_space<vmem>>, vector<16x128xf32>,
    %90 = arith.truncf %87 : vector<16x128xf32> to vector<16x128xbf16>
    %91 = arith.index_cast %c1_i32 : i32 to index
    %c0_43 = arith.constant 0 : index
    %c0_44 = arith.constant 0 : index
    %92 = vector.load %arg6[%91, %c0_43, %c0_44] : memref<4x16x128xbf16, #tpu.memory_space<vmem>>, vector<1x16x128xbf16>
    %93 = vector.shape_cast %92 : vector<1x16x128xbf16> to vector<16x128xbf16>
    %94 = vector.shape_cast %90 : vector<16x128xbf16> to vector<1x16x128xbf16>
    tpu.vector_store %arg6[%91, %c0_43, %c0_44], %94 {strides = array<i32>} : memref<4x16x128xbf16, #tpu.memory_space<vmem>>, vector<1x16x128xbf16>,
    %c2_i32 = arith.constant 2 : i32
    %c16_i32_45 = arith.constant 16 : i32
    %95 = arith.muli %c2_i32, %c16_i32_45 : i32
    %96 = tpu.assume_multiple %95, 16 : i32
    %97 = arith.index_cast %96 : i32 to index
    %c0_46 = arith.constant 0 : index
    %98 = vector.load %arg9[%97, %c0_46] : memref<64x512xf32, #tpu.memory_space<vmem>>, vector<16x512xf32>
    %c0_47 = arith.constant 0 : index
    %c0_48 = arith.constant 0 : index
    %99 = vector.load %arg7[%c0_47, %c0_48] : memref<16x128xf32, #tpu.memory_space<vmem>>, vector<16x128xf32>
    %c0_49 = arith.constant 0 : index
    %c0_50 = arith.constant 0 : index
    %100 = vector.load %arg8[%c0_49, %c0_50] : memref<16x128xf32, #tpu.memory_space<vmem>>, vector<16x128xf32>
    %101 = arith.truncf %99 : vector<16x128xf32> to vector<16x128xbf16>
    %c0_51 = arith.constant 0 : index
    %c0_52 = arith.constant 0 : index
    %102 = vector.load %arg4[%c0_51, %c0_52] : memref<128x512xbf16, #tpu.memory_space<vmem>>, vector<128x512xbf16>
    %cst_53 = arith.constant dense<0.000000e+00> : vector<16x512xf32>
    %103 = tpu.matmul %101, %102, %cst_53 {dimension_numbers = #tpu.dot_dimension_numbers<[1], [0], [0], [1], [0, 0, 1, 1], [], []>} : vector<16x128xbf16>, vector<128x512xbf16>, vector<16x512xf32> -> vector<16x512xf32>
    %104 = arith.addf %98, %103 : vector<16x512xf32>
    %105 = vector.extract_strided_slice %104 {offsets = [0, 0], sizes = [16, 128], strides = [1, 1]} : vector<16x512xf32> to vector<16x128xf32>
    %106 = arith.negf %105 : vector<16x128xf32>
    %107 = math.exp %106 : vector<16x128xf32>
    %cst_54 = arith.constant 1.000000e+00 : f32
    %108 = vector.broadcast %cst_54 : f32 to vector<16x128xf32>
    %109 = arith.addf %108, %107 : vector<16x128xf32>
    %110 = arith.divf %108, %109 : vector<16x128xf32>
    %111 = vector.extract_strided_slice %104 {offsets = [0, 128], sizes = [16, 128], strides = [1, 1]} : vector<16x512xf32> to vector<16x128xf32>
    %112 = arith.negf %111 : vector<16x128xf32>
    %113 = math.exp %112 : vector<16x128xf32>
    %cst_55 = arith.constant 1.000000e+00 : f32
    %114 = vector.broadcast %cst_55 : f32 to vector<16x128xf32>
    %115 = arith.addf %114, %113 : vector<16x128xf32>
    %116 = arith.divf %114, %115 : vector<16x128xf32>
    %117 = vector.extract_strided_slice %104 {offsets = [0, 256], sizes = [16, 128], strides = [1, 1]} : vector<16x512xf32> to vector<16x128xf32>
    %118 = math.tanh %117 : vector<16x128xf32>
    %119 = vector.extract_strided_slice %104 {offsets = [0, 384], sizes = [16, 128], strides = [1, 1]} : vector<16x512xf32> to vector<16x128xf32>
    %120 = arith.negf %119 : vector<16x128xf32>
    %121 = math.exp %120 : vector<16x128xf32>
    %cst_56 = arith.constant 1.000000e+00 : f32
    %122 = vector.broadcast %cst_56 : f32 to vector<16x128xf32>
    %123 = arith.addf %122, %121 : vector<16x128xf32>
    %124 = arith.divf %122, %123 : vector<16x128xf32>
    %125 = arith.mulf %116, %100 : vector<16x128xf32>
    %126 = arith.mulf %110, %118 : vector<16x128xf32>
    %127 = arith.addf %125, %126 : vector<16x128xf32>
    %128 = math.tanh %127 : vector<16x128xf32>
    %129 = arith.mulf %124, %128 : vector<16x128xf32>
    %c0_57 = arith.constant 0 : index
    %c0_58 = arith.constant 0 : index
    %130 = vector.load %arg7[%c0_57, %c0_58] : memref<16x128xf32, #tpu.memory_space<vmem>>, vector<16x128xf32>
    tpu.vector_store %arg7[%c0_57, %c0_58], %129 {strides = array<i32>} : memref<16x128xf32, #tpu.memory_space<vmem>>, vector<16x128xf32>,
    %c0_59 = arith.constant 0 : index
    %c0_60 = arith.constant 0 : index
    %131 = vector.load %arg8[%c0_59, %c0_60] : memref<16x128xf32, #tpu.memory_space<vmem>>, vector<16x128xf32>
    tpu.vector_store %arg8[%c0_59, %c0_60], %127 {strides = array<i32>} : memref<16x128xf32, #tpu.memory_space<vmem>>, vector<16x128xf32>,
    %132 = arith.truncf %129 : vector<16x128xf32> to vector<16x128xbf16>
    %133 = arith.index_cast %c2_i32 : i32 to index
    %c0_61 = arith.constant 0 : index
    %c0_62 = arith.constant 0 : index
    %134 = vector.load %arg6[%133, %c0_61, %c0_62] : memref<4x16x128xbf16, #tpu.memory_space<vmem>>, vector<1x16x128xbf16>
    %135 = vector.shape_cast %134 : vector<1x16x128xbf16> to vector<16x128xbf16>
    %136 = vector.shape_cast %132 : vector<16x128xbf16> to vector<1x16x128xbf16>
    tpu.vector_store %arg6[%133, %c0_61, %c0_62], %136 {strides = array<i32>} : memref<4x16x128xbf16, #tpu.memory_space<vmem>>, vector<1x16x128xbf16>,
    %c3_i32 = arith.constant 3 : i32
    %c16_i32_63 = arith.constant 16 : i32
    %137 = arith.muli %c3_i32, %c16_i32_63 : i32
    %138 = tpu.assume_multiple %137, 16 : i32
    %139 = arith.index_cast %138 : i32 to index
    %c0_64 = arith.constant 0 : index
    %140 = vector.load %arg9[%139, %c0_64] : memref<64x512xf32, #tpu.memory_space<vmem>>, vector<16x512xf32>
    %c0_65 = arith.constant 0 : index
    %c0_66 = arith.constant 0 : index
    %141 = vector.load %arg7[%c0_65, %c0_66] : memref<16x128xf32, #tpu.memory_space<vmem>>, vector<16x128xf32>
    %c0_67 = arith.constant 0 : index
    %c0_68 = arith.constant 0 : index
    %142 = vector.load %arg8[%c0_67, %c0_68] : memref<16x128xf32, #tpu.memory_space<vmem>>, vector<16x128xf32>
    %143 = arith.truncf %141 : vector<16x128xf32> to vector<16x128xbf16>
    %c0_69 = arith.constant 0 : index
    %c0_70 = arith.constant 0 : index
    %144 = vector.load %arg4[%c0_69, %c0_70] : memref<128x512xbf16, #tpu.memory_space<vmem>>, vector<128x512xbf16>
    %cst_71 = arith.constant dense<0.000000e+00> : vector<16x512xf32>
    %145 = tpu.matmul %143, %144, %cst_71 {dimension_numbers = #tpu.dot_dimension_numbers<[1], [0], [0], [1], [0, 0, 1, 1], [], []>} : vector<16x128xbf16>, vector<128x512xbf16>, vector<16x512xf32> -> vector<16x512xf32>
    %146 = arith.addf %140, %145 : vector<16x512xf32>
    %147 = vector.extract_strided_slice %146 {offsets = [0, 0], sizes = [16, 128], strides = [1, 1]} : vector<16x512xf32> to vector<16x128xf32>
    %148 = arith.negf %147 : vector<16x128xf32>
    %149 = math.exp %148 : vector<16x128xf32>
    %cst_72 = arith.constant 1.000000e+00 : f32
    %150 = vector.broadcast %cst_72 : f32 to vector<16x128xf32>
    %151 = arith.addf %150, %149 : vector<16x128xf32>
    %152 = arith.divf %150, %151 : vector<16x128xf32>
    %153 = vector.extract_strided_slice %146 {offsets = [0, 128], sizes = [16, 128], strides = [1, 1]} : vector<16x512xf32> to vector<16x128xf32>
    %154 = arith.negf %153 : vector<16x128xf32>
    %155 = math.exp %154 : vector<16x128xf32>
    %cst_73 = arith.constant 1.000000e+00 : f32
    %156 = vector.broadcast %cst_73 : f32 to vector<16x128xf32>
    %157 = arith.addf %156, %155 : vector<16x128xf32>
    %158 = arith.divf %156, %157 : vector<16x128xf32>
    %159 = vector.extract_strided_slice %146 {offsets = [0, 256], sizes = [16, 128], strides = [1, 1]} : vector<16x512xf32> to vector<16x128xf32>
    %160 = math.tanh %159 : vector<16x128xf32>
    %161 = vector.extract_strided_slice %146 {offsets = [0, 384], sizes = [16, 128], strides = [1, 1]} : vector<16x512xf32> to vector<16x128xf32>
    %162 = arith.negf %161 : vector<16x128xf32>
    %163 = math.exp %162 : vector<16x128xf32>
    %cst_74 = arith.constant 1.000000e+00 : f32
    %164 = vector.broadcast %cst_74 : f32 to vector<16x128xf32>
    %165 = arith.addf %164, %163 : vector<16x128xf32>
    %166 = arith.divf %164, %165 : vector<16x128xf32>
    %167 = arith.mulf %158, %142 : vector<16x128xf32>
    %168 = arith.mulf %152, %160 : vector<16x128xf32>
    %169 = arith.addf %167, %168 : vector<16x128xf32>
    %170 = math.tanh %169 : vector<16x128xf32>
    %171 = arith.mulf %166, %170 : vector<16x128xf32>
    %c0_75 = arith.constant 0 : index
    %c0_76 = arith.constant 0 : index
    %172 = vector.load %arg7[%c0_75, %c0_76] : memref<16x128xf32, #tpu.memory_space<vmem>>, vector<16x128xf32>
    tpu.vector_store %arg7[%c0_75, %c0_76], %171 {strides = array<i32>} : memref<16x128xf32, #tpu.memory_space<vmem>>, vector<16x128xf32>,
    %c0_77 = arith.constant 0 : index
    %c0_78 = arith.constant 0 : index
    %173 = vector.load %arg8[%c0_77, %c0_78] : memref<16x128xf32, #tpu.memory_space<vmem>>, vector<16x128xf32>
    tpu.vector_store %arg8[%c0_77, %c0_78], %169 {strides = array<i32>} : memref<16x128xf32, #tpu.memory_space<vmem>>, vector<16x128xf32>,
    %174 = arith.truncf %171 : vector<16x128xf32> to vector<16x128xbf16>
    %175 = arith.index_cast %c3_i32 : i32 to index
    %c0_79 = arith.constant 0 : index
    %c0_80 = arith.constant 0 : index
    %176 = vector.load %arg6[%175, %c0_79, %c0_80] : memref<4x16x128xbf16, #tpu.memory_space<vmem>>, vector<1x16x128xbf16>
    %177 = vector.shape_cast %176 : vector<1x16x128xbf16> to vector<16x128xbf16>
    %178 = vector.shape_cast %174 : vector<16x128xbf16> to vector<1x16x128xbf16>
    tpu.vector_store %arg6[%175, %c0_79, %c0_80], %178 {strides = array<i32>} : memref<4x16x128xbf16, #tpu.memory_space<vmem>>, vector<1x16x128xbf16>,
    %c4_i32 = arith.constant 4 : i32
    return
  }
  func.func @transform_0(%arg0: i32, %arg1: i32) -> (i32, i32, i32) {
    %c0_i32 = arith.constant 0 : i32
    %c0_i32_0 = arith.constant 0 : i32
    return %arg1, %arg0, %c0_i32 : i32, i32, i32
  }
  func.func @transform_1(%arg0: i32, %arg1: i32) -> (i32, i32) {
    %c0_i32 = arith.constant 0 : i32
    %c0_i32_0 = arith.constant 0 : i32
    %c0_i32_1 = arith.constant 0 : i32
    return %c0_i32, %c0_i32_0 : i32, i32
  }
  func.func @transform_2(%arg0: i32, %arg1: i32) -> (i32, i32) {
    %c0_i32 = arith.constant 0 : i32
    %c0_i32_0 = arith.constant 0 : i32
    %c0_i32_1 = arith.constant 0 : i32
    return %c0_i32, %c0_i32_0 : i32, i32
  }
  func.func @transform_3(%arg0: i32, %arg1: i32) -> (i32, i32) {
    %c0_i32 = arith.constant 0 : i32
    %c0_i32_0 = arith.constant 0 : i32
    %c0_i32_1 = arith.constant 0 : i32
    return %c0_i32, %c0_i32_0 : i32, i32
  }
  func.func @transform_4(%arg0: i32, %arg1: i32) -> (i32, i32, i32) {
    %c0_i32 = arith.constant 0 : i32
    %c0_i32_0 = arith.constant 0 : i32
    return %arg1, %arg0, %c0_i32 : i32, i32, i32
  }
}

</mosaic_0001>

<bundles_post_ra>
// kernel: tpu_custom_call.1
= control target key start
LH: loop header
LB: loop body
LE: loop exit
PB: predicated region body
PF: predicated region fallthrough
CT: control target
= control target key end

     0   :  { %9 = vsyncpa [#allocation6], 0  ;;  %s3691_s0 = inlined_call_operand.hbm [shape: bf16[8,16,128], index: 0, kind: input, shape index: {}]   ;;  %s3692_s1 = inlined_call_operand.hbm [shape: bf16[128,512], index: 1, kind: input, shape index: {}]   ;;  %s3693_s2 = inlined_call_operand.hbm [shape: bf16[128,512], index: 2, kind: input, shape index: {}]   ;;  %s3694_s3 = inlined_call_operand.vmem [shape: f32[1,512], index: 3, kind: input, shape index: {}]   ;;  %s3695_s4 = inlined_call_operand.hbm [shape: bf16[8,16,128], index: 4, kind: output, shape index: {}]  }
   0x1   :  { %11 = vsyncpa [#allocation6 + $0x1], 0 }
   0x2   :  { %12 = vsyncpa [#allocation9], 0 }
   0x3   :  { %13 = vsyncpa [#allocation7], 0 }
   0x4   :  { %15 = vsyncpa [#allocation7 + $0x1], 0  ;;  %s3163_s15 = smov 0   ;;  %s3165_s16 = smov 0  }
   0x5   :  { %s3167_s17 = smov 0   ;;  %s3169_s18 = smov 0  }
   0x6   :  { %s3171_s19 = smov 0   ;;  %s3173_s20 = smov 0  }
   0x7 LB: > { %s2286_s21 = sadd.s32 4294967295, %s3124_s20   ;;  %s2287_s22 = sadd.s32 4294967294, %s3124_s20   ;;  %s3124_s20 = sphi %s3173_s20, %s21_s20   ;;  %s3120_s19 = sphi %s3171_s19, %s3717_s19   ;;  %s3116_s18 = sphi %s3169_s18, %s3716_s18   ;;  %s3112_s17 = sphi %s3167_s17, %s3715_s17   ;;  %s3108_s16 = sphi %s3165_s16, %s3714_s16   ;;  %s3104_s15 = sphi %s3163_s15, %s3713_s15  }
   0x8   : > { %p55_p0 = scmp.ne.s32.totalorder %s3108_s16, %s3104_s15  ;;  %p3197_p1 = scmp.eq.s32.totalorder %s2286_s21, 0 }
   0x9   : > { %p3201_p2 = scmp.eq.s32.totalorder %s2286_s21, 1  ;;  %p150_p3 = scmp.eq.s32.totalorder %s2287_s22, 1 }
   0xa   : > { %s3700_s23 = scalar_select %p3197_p1, 1, 0 }
   0xb   : > { %p3207_p4 = por %p3197_p1, %p55_p0  ;;  %p2288_p5 = scmp.ge.s32.totalorder %s3124_s20, 1 }
   0xc   : > { %p3212_p6 = por %p150_p3, %p55_p0  ;;  %p157_p7 = scmp.lt.s32.totalorder %s3124_s20, 3 }
   0xd   : > { %s3702_s25 = scalar_select %p3207_p4, 1, 0 }
   0xe   : > { %s3703_s26 = scalar_select %p3212_p6, 1, 0 }
   0xf   : > { %p3217_p8 = pnand %p2288_p5, %p157_p7  ;;  %s3126_s28 = smov [#allocation8]  }
  0x10   : > { %s169_s29 = sshll.u32 %s3126_s28, 4  ;;  %s3127_s5 = smov [#allocation10]   ;;  %s3221_s29 = int_to_ptr.vmem [resolvable:$true] %s169_s29 }
  0x11   : > { %p2621_p9 = pneg %p3217_p8  ;;  %s182_s6 = sshll.u32 %s3127_s5, 4  ;;  %s3232_s6 = int_to_ptr.vmem [resolvable:$true] %s182_s6 }
  0x12   : > { %s2952_s9 = scalar_lea.hbm %s3692_s1, 4096 }
  0x13   : > { %p3228_p11 = pnand %p2621_p9, %p3197_p1  ;;  %p2953_p12 = scmp.ne.s32.totalorder %s3692_s1, %s2952_s9 }
  0x14   : > { %p2959_p5 = scmp.lt.u32.totalorder %s2952_s9, %s3692_s1 }
  0x15   : > { %p2954_p13 = pneg %p3228_p11 }
  0x17   : > { %p2955_p0 = pnand %p2954_p13, %p2953_p12 }
  0x19   : > { %p2956_p3 = pneg %p2955_p0 }
  0x1b   : > { %p2961_p7 = pnand %p2959_p5, %p2956_p3 }
  0x1d   : > { %2964 = shalt.err (!%p2961_p7)
}
  0x1e   : > { %s2965_s14 = scalar_lea.vmem %s3221_s29, 4096  ;;  %p2973_p1 = scmp.lt.s32.totalorder %s3221_s29, %s3221_s29 }
  0x1f   : > { %p2966_p9 = scmp.ne.s32.totalorder %s3221_s29, %s2965_s14  ;;  %p2974_p12 = scmp.lt.s32.totalorder %s2965_s14, %s2965_s14 }
  0x21   : > { %p2968_p10 = pnand %p2966_p9, %p2954_p13  ;;  %p2975_p0 = por %p2974_p12, %p2973_p1 }
  0x23   : > { %p2969_p6 = pneg %p2968_p10 }
  0x25   : > { %p2976_p4 = pnand %p2975_p0, %p2969_p6 }
  0x27   : > { %2979 = shalt.err (!%p2976_p4)
}
  0x28   : > { %s3128_s21 = smov 256   ;;  %s3129_s22 = smov 16  }
  0x29   : > { %2624 = dma.hbm_to_vmem [thread:$0]  (!%p3228_p11), %s3692_s1, 4096, %s3221_s29, [#allocation9], %s3128_s21, %s3128_s21, %s3129_s22  }
  0x2a   : > { %s2980_s9 = scalar_lea.hbm %s3693_s2, 4096 }
  0x2b   : > { %p2981_p1 = scmp.ne.s32.totalorder %s3693_s2, %s2980_s9  ;;  %p2987_p10 = scmp.lt.u32.totalorder %s2980_s9, %s3693_s2 }
  0x2d   : > { %p2983_p4 = pnand %p2981_p1, %p2954_p13 }
  0x2f   : > { %p2984_p6 = pneg %p2983_p4 }
  0x31   : > { %p2989_p3 = pnand %p2987_p10, %p2984_p6 }
  0x33   : > { %2992 = shalt.err (!%p2989_p3)
}
  0x34   : > { %s2993_s29 = scalar_lea.vmem %s3232_s6, 4096  ;;  %p3001_p12 = scmp.lt.s32.totalorder %s3232_s6, %s3232_s6 }
  0x35   : > { %p2994_p5 = scmp.ne.s32.totalorder %s3232_s6, %s2993_s29  ;;  %p3002_p0 = scmp.lt.s32.totalorder %s2993_s29, %s2993_s29 }
  0x37   : > { %p2996_p7 = pnand %p2994_p5, %p2954_p13  ;;  %p3003_p1 = por %p3002_p0, %p3001_p12 }
  0x39   : > { %p2997_p9 = pneg %p2996_p7 }
  0x3b   : > { %p3004_p4 = pnand %p3003_p1, %p2997_p9 }
  0x3d   : > { %3007 = shalt.err (!%p3004_p4)
}
  0x3e   : > { %2627 = dma.hbm_to_vmem [thread:$0]  (!%p3228_p11), %s3693_s2, 4096, %s3232_s6, [#allocation9], %s3128_s21, %s3128_s21, %s3129_s22  }
  0x3f   : > { %s30_s5 = sadd.s32 1, %s3120_s19  ;;  %s42_s7 = sadd.s32 1, %s3112_s17 }
  0x40   : > { %p31_p13 = scmp.ge.s32.totalorder %s30_s5, 2  ;;  %p49_p6 = scmp.ne.s32.totalorder %s3112_s17, %s3108_s16 }
  0x41   : > { %p50_p10 = scmp.eq.s32.totalorder %s3124_s20, 0  ;;  %p2638_p3 = scmp.lt.s32.totalorder %s3124_s20, 2 }
  0x42   : > { %s3719_s5 = smov (%p31_p13, %s30_s5), 0  ;;  %p3296_p7 = por %p3201_p2, %p49_p6 }
  0x43   : > { %p51_p5 = por %p50_p10, %p49_p6  ;;  %s37_s8 = ssub.s32 %s3120_s19, %s3719_s5 }
  0x44   : > { %s3706_s30 = scalar_select %p3296_p7, 1, 0 }
  0x45   : > { %s199_s9 = sand.u32 1, %s3112_s17   ;;  %p40_p9 = scmp.eq.s32.totalorder %s37_s8, 0 }
  0x46   : > { %s2292_s6 = sshll.u32 %s199_s9, 5  ;;  %s2511_s21 = sshll.u32 %s3120_s19, 9 }
  0x47   : > { %s3305_s22 = scalar_select %p40_p9, %s3112_s17, %s42_s7  }
  0x48   : > { %s3310_s12 = scalar_lea.hbm %s3691_s0, %s2511_s21  ;;  %s203_s24 = scalar_lea.vmem [#allocation5], %s2292_s6 }
  0x49   : > { %s213_s13 = sshll.u32 %s203_s24, 4  ;;  %p3314_p2 = pnand %p2638_p3, %p51_p5  ;;  %s3318_s13 = int_to_ptr.vmem [resolvable:$true] %s213_s13 }
  0x4a   : > { %s3320_s14 = scalar_lea.sflag [#allocation6], %s199_s9  ;;  %s3008_s28 = scalar_lea.hbm %s3310_s12, 512 }
  0x4b   : > { %p3009_p11 = scmp.ne.s32.totalorder %s3310_s12, %s3008_s28  ;;  %p3010_p12 = pneg %p3314_p2 }
  0x4c   : > { %s3013_s6 = scalar_lea.hbm %s3691_s0, 1024  ;;  %p3014_p4 = scmp.lt.u32.totalorder %s3310_s12, %s3691_s0 }
  0x4d   : > { %p3011_p0 = pnand %p3010_p12, %p3009_p11  ;;  %p3015_p13 = scmp.lt.u32.totalorder %s3013_s6, %s3008_s28 }
  0x4e   : > { %p3017_p10 = scmp.lt.u32.totalorder %s3008_s28, %s3310_s12 }
  0x4f   : > { %p3012_p1 = pneg %p3011_p0  ;;  %p3016_p6 = por %p3015_p13, %p3014_p4 }
  0x51   : > { %p3018_p3 = por %p3017_p10, %p3016_p6 }
  0x53   : > { %p3019_p5 = pnand %p3018_p3, %p3012_p1 }
  0x55   : > { %3022 = shalt.err (!%p3019_p5)
}
  0x56   : > { %s3023_s9 = scalar_lea.vmem %s3318_s13, 512  ;;  %s3130_s11 = smov [#allocation5]  }
  0x57   : > { %p3024_p9 = scmp.ne.s32.totalorder %s3318_s13, %s3023_s9  ;;  %s3028_s24 = sshll.u32 %s3130_s11, 4  ;;  %s3029_s24 = int_to_ptr.vmem [resolvable:$false] %s3028_s24 }
  0x58   : > { %s3030_s7 = scalar_lea.vmem %s3029_s24, 1024  ;;  %p3031_p7 = scmp.lt.s32.totalorder %s3318_s13, %s3029_s24 }
  0x59   : > { %p3026_p11 = pnand %p3024_p9, %p3010_p12  ;;  %p3032_p4 = scmp.lt.s32.totalorder %s3030_s7, %s3023_s9 }
  0x5b   : > { %p3027_p0 = pneg %p3026_p11  ;;  %p3033_p13 = por %p3032_p4, %p3031_p7 }
  0x5d   : > { %p3034_p6 = pnand %p3033_p13, %p3027_p0 }
  0x5f   : > { %3037 = shalt.err (!%p3034_p6)
}
  0x60   : > { %s3131_s28 = smov 64   ;;  %s3132_s8 = smov 4  }
  0x61   : > { %2631 = dma.hbm_to_vmem [thread:$0]  (!%p3314_p2), %s3310_s12, 512, %s3318_s13, %s3320_s14, %s3131_s28, %s3131_s28, %s3132_s8  }
  0x62   : > { %225 = sbr.rel (%p3217_p8) target bundleno = 1251 (0x4e3), region = 36  ;;  %s3351_s6 = sand.u32 (!%p3217_p8), 1, %s3108_s16  }
  0x63   : > { %s2297_s21 = sshll.u32 (!%p3217_p8), %s3351_s6, 5  ;;  %s228_s10 = scalar_lea.sflag (!%p3217_p8), [#allocation6], %s3351_s6 }
  0x64   : > { %s3355_s9 = scalar_lea.vmem (!%p3217_p8), [#allocation5], %s2297_s21  ;;  %p3708_p7 = scmp.ne.s32.totalorder (!%p3217_p8), %s3702_s25, 0 }
  0x69   : > { %3091 = dma.done.wait (%p3708_p7), %s228_s10, 512  }
  0x6a   : > { %3093 = vsyncadd (%p3708_p7), %s228_s10, 4294966784  ;;  %p3709_p2 = scmp.ne.s32.totalorder %s3700_s23, 0 }
  0x6c   : > { %3095 = dma.done.wait (%p3709_p2), [#allocation9], 8192  }
  0x6d   : > { %3097 = vsyncadd (%p3709_p2), [#allocation9], 4294959104  ;;  %s3365_s27 = scalar_lea.vmem [#allocation11], %s2297_s21  ;;  %p2301_p8 = scmp.ne.s32.totalorder %s3116_s18, 0 }
  0x6e   : > { %v3133_v0 = vmov (!%p2301_p8), 0.0  }
  0x6f   : > { %272 = sbr.rel (%p2301_p8) target bundleno = 118 (0x76), region = 52  ;;  %273 = vst [vmem:[#allocation2] sm:$0xff] (!%p2301_p8), %v3133_v0  ;;  %274 = vst [vmem:[#allocation2 + $0x8] sm:$0xff] (!%p2301_p8), %v3133_v0 }
  0x70   : > { %275 = vst [vmem:[#allocation3] sm:$0xff] (!%p2301_p8), %v3133_v0  ;;  %276 = vst [vmem:[#allocation3 + $0x8] sm:$0xff] (!%p2301_p8), %v3133_v0 }
  0x76 PF: > { %v2700_v1 = vld [vmem:[#allocation8 + $0x4] ss:$16 sps:$4 sm:$0xff]   ;;  %v2702_v2 = vld [vmem:[#allocation8 + $0xc] ss:$16 sps:$4 sm:$0xff]   ;;  %v3134_v3 = vmov 0   ;;  %s2521_s12 = sshll.u32 %s3116_s18, 9 }
  0x77   : > { %555 = vmatprep.mubr.bf16.mxu0 %v3134_v3  ;;  %628 = vmatprep.mubr.bf16.mxu1 %v3134_v3  ;;  %v2704_v4 = vld [vmem:[#allocation8] ss:$16 sps:$4 sm:$0xff]   ;;  %v2705_v5 = vld [vmem:[#allocation8 + $0x8] ss:$16 sps:$4 sm:$0xff]   ;;  %v2706_v6 = vld [vmem:[#allocation8 + $0x24] ss:$16 sps:$4 sm:$0xff]   ;;  %s3639_s11 = scalar_lea.hbm %s3695_s4, %s2521_s12 }
  0x78   : > { %523 = vmatprep.subr.bf16.mxu0 %v2700_v1  ;;  %596 = vmatprep.subr.bf16.mxu1 %v2702_v2  ;;  %v2708_v7 = vld [vmem:[#allocation8 + $0x2c] ss:$16 sps:$4 sm:$0xff]   ;;  %v2710_v8 = vld [vmem:[#allocation8 + $0x20] ss:$16 sps:$4 sm:$0xff]   ;;  %v2711_v9 = vld [vmem:[#allocation8 + $0x28] ss:$16 sps:$4 sm:$0xff]  }
  0x79   : > { %524 = vmatpush1.bf16.msra.mxu0 %v2704_v4  ;;  %597 = vmatpush1.bf16.msra.mxu1 %v2705_v5  ;;  %v2712_v10 = vld [vmem:[#allocation8 + $0x44] ss:$16 sps:$4 sm:$0xff]   ;;  %v2714_v11 = vld [vmem:[#allocation8 + $0x4c] ss:$16 sps:$4 sm:$0xff]   ;;  %v2716_v12 = vld [vmem:[#allocation8 + $0x40] ss:$16 sps:$4 sm:$0xff]  }
  0x7a   : > { %525 = vmatprep.subr.bf16.mxu0 %v2706_v6  ;;  %598 = vmatprep.subr.bf16.mxu1 %v2708_v7  ;;  %v2717_v13 = vld [vmem:[#allocation8 + $0x48] ss:$16 sps:$4 sm:$0xff]   ;;  %v2718_v14 = vld [vmem:[#allocation8 + $0x64] ss:$16 sps:$4 sm:$0xff]   ;;  %v2720_v15 = vld [vmem:[#allocation8 + $0x6c] ss:$16 sps:$4 sm:$0xff]  }
  0x7b   : > { %v2722_v16 = vld [vmem:[#allocation8 + $0x60] ss:$16 sps:$4 sm:$0xff]   ;;  %v2723_v17 = vld [vmem:[#allocation8 + $0x68] ss:$16 sps:$4 sm:$0xff]   ;;  %v2724_v18 = vld [vmem:[#allocation8 + $0x84] ss:$16 sps:$4 sm:$0xff]  }
  0x7c   : > { %v2726_v19 = vld [vmem:[#allocation8 + $0x8c] ss:$16 sps:$4 sm:$0xff]   ;;  %v2728_v20 = vld [vmem:[#allocation8 + $0x80] ss:$16 sps:$4 sm:$0xff]   ;;  %v2729_v21 = vld [vmem:[#allocation8 + $0x88] ss:$16 sps:$4 sm:$0xff]  }
  0x7d   : > { %526 = vmatpush1.bf16.msra.mxu0 %v2710_v8  ;;  %599 = vmatpush1.bf16.msra.mxu1 %v2711_v9  ;;  %v2730_v22 = vld [vmem:[#allocation8 + $0xa4] ss:$16 sps:$4 sm:$0xff]   ;;  %v2732_v23 = vld [vmem:[#allocation8 + $0xac] ss:$16 sps:$4 sm:$0xff]   ;;  %v2734_v24 = vld [vmem:[#allocation8 + $0xa0] ss:$16 sps:$4 sm:$0xff]  }
  0x7e   : > { %527 = vmatprep.subr.bf16.mxu0 %v2712_v10  ;;  %600 = vmatprep.subr.bf16.mxu1 %v2714_v11  ;;  %v2735_v25 = vld [vmem:[#allocation8 + $0xa8] ss:$16 sps:$4 sm:$0xff]   ;;  %v2736_v26 = vld [vmem:[#allocation8 + $0xc4] ss:$16 sps:$4 sm:$0xff]   ;;  %v2738_v27 = vld [vmem:[#allocation8 + $0xcc] ss:$16 sps:$4 sm:$0xff]   ;;  %v319_v10 = vlaneseq }
  0x7f   : > { %v2740_v28 = vld [vmem:[#allocation8 + $0xc0] ss:$16 sps:$4 sm:$0xff]   ;;  %v2741_v29 = vld [vmem:[#allocation8 + $0xc8] ss:$16 sps:$4 sm:$0xff]   ;;  %v2742_v30 = vld [vmem:[#allocation8 + $0xe4] ss:$16 sps:$4 sm:$0xff]  }
  0x80   : > { %v2744_v31 = vld [vmem:[#allocation8 + $0xec] ss:$16 sps:$4 sm:$0xff]   ;;  %v2746_v32 = vld [vmem:[#allocation8 + $0xe0] ss:$16 sps:$4 sm:$0xff]   ;;  %v2747_v33 = vld [vmem:[#allocation8 + $0xe8] ss:$16 sps:$4 sm:$0xff]  }
  0x81   : > { %528 = vmatpush1.bf16.msra.mxu0 %v2716_v12  ;;  %601 = vmatpush1.bf16.msra.mxu1 %v2717_v13  ;;  %v3370_v34 = vld [vmem:[#allocation10 + $0x4] ss:$16 sps:$4 sm:$0xff]   ;;  %v3372_v35 = vld [vmem:[#allocation10 + $0xc] ss:$16 sps:$4 sm:$0xff]   ;;  %v3375_v37 = vld [vmem:[#allocation10] ss:$16 sps:$4 sm:$0xff]  }
  0x82   : > { %529 = vmatprep.subr.bf16.mxu0 %v2718_v14  ;;  %602 = vmatprep.subr.bf16.mxu1 %v2720_v15  ;;  %v2748_v36 = vld [vmem:[%s3355_s9] sm:$0xff]   ;;  %v3377_v38 = vld [vmem:[#allocation10 + $0x8] ss:$16 sps:$4 sm:$0xff]   ;;  %v3383_v40 = vld [vmem:[#allocation10 + $0x2c] ss:$16 sps:$4 sm:$0xff]   ;;  %v320_v11 = vshrl.u32 %v319_v10, 7 }
  0x83   : > { %v3381_v39 = vld [vmem:[#allocation10 + $0x24] ss:$16 sps:$4 sm:$0xff]   ;;  %v3385_v41 = vld [vmem:[#allocation10 + $0x20] ss:$16 sps:$4 sm:$0xff]   ;;  %v3389_v42 = vld [vmem:[#allocation10 + $0x28] ss:$16 sps:$4 sm:$0xff]  }
  0x84   : > { %v3393_v43 = vld [vmem:[#allocation10 + $0x44] ss:$16 sps:$4 sm:$0xff]   ;;  %v3395_v44 = vld [vmem:[#allocation10 + $0x4c] ss:$16 sps:$4 sm:$0xff]   ;;  %v3400_v46 = vld [vmem:[#allocation10 + $0x40] ss:$16 sps:$4 sm:$0xff]  }
  0x85   : > { %530 = vmatpush1.bf16.msra.mxu0 %v2722_v16  ;;  %603 = vmatpush1.bf16.msra.mxu1 %v2723_v17  ;;  %v2761_v45 = vld [vmem:[%s3355_s9 + $0x8] sm:$0xff]   ;;  %v3406_v48 = vld [vmem:[#allocation10 + $0x64] ss:$16 sps:$4 sm:$0xff]   ;;  %v3412_v50 = vld [vmem:[#allocation10 + $0x60] ss:$16 sps:$4 sm:$0xff]   ;;  %v321_v12 = vsub.s32 0, %v320_v11 }
  0x86   : > { %531 = vmatprep.subr.bf16.mxu0 %v2724_v18  ;;  %604 = vmatprep.subr.bf16.mxu1 %v2726_v19  ;;  %v3402_v47 = vld [vmem:[#allocation10 + $0x48] ss:$16 sps:$4 sm:$0xff]   ;;  %v3410_v49 = vld [vmem:[#allocation10 + $0x6c] ss:$16 sps:$4 sm:$0xff]   ;;  %v3418_v52 = vld [vmem:[#allocation10 + $0x84] ss:$16 sps:$4 sm:$0xff]  }
  0x87   : > { %v3414_v51 = vld [vmem:[#allocation10 + $0x68] ss:$16 sps:$4 sm:$0xff]   ;;  %v3422_v53 = vld [vmem:[#allocation10 + $0x8c] ss:$16 sps:$4 sm:$0xff]   ;;  %v2774_v54 = vld [vmem:[%s3355_s9 + $0x10] sm:$0xff]   ;;  %v325_v14 = vsub.s32 1, %v320_v11 }
  0x88   : > { %v3427_v55 = vld [vmem:[#allocation10 + $0x80] ss:$16 sps:$4 sm:$0xff]   ;;  %v3429_v56 = vld [vmem:[#allocation10 + $0x88] ss:$16 sps:$4 sm:$0xff]   ;;  %v3431_v57 = vld [vmem:[#allocation10 + $0xa4] ss:$16 sps:$4 sm:$0xff]  }
  0x89   : > { %532 = vmatpush1.bf16.msra.mxu0 %v2728_v20  ;;  %605 = vmatpush1.bf16.msra.mxu1 %v2729_v21  ;;  %v3433_v58 = vld [vmem:[#allocation10 + $0xac] ss:$16 sps:$4 sm:$0xff]   ;;  %v3439_v59 = vld [vmem:[#allocation10 + $0xa0] ss:$16 sps:$4 sm:$0xff]   ;;  %v3441_v60 = vld [vmem:[#allocation10 + $0xa8] ss:$16 sps:$4 sm:$0xff]  }
  0x8a   : > { %533 = vmatprep.subr.bf16.mxu0 %v2730_v22  ;;  %606 = vmatprep.subr.bf16.mxu1 %v2732_v23  ;;  %v3447_v61 = vld [vmem:[#allocation10 + $0xc4] ss:$16 sps:$4 sm:$0xff]   ;;  %v3449_v62 = vld [vmem:[#allocation10 + $0xcc] ss:$16 sps:$4 sm:$0xff]   ;;  %v3456_v0 = vld [vmem:[#allocation10 + $0xc0] ss:$16 sps:$4 sm:$0xff]  }
  0x8b   : > { %v2787_v63 = vld [vmem:[%s3355_s9 + $0x18] sm:$0xff]   ;;  %v3462_v2 = vld [vmem:[#allocation10 + $0xe4] ss:$16 sps:$4 sm:$0xff]   ;;  %v3466_v5 = vld [vmem:[#allocation10 + $0xe0] ss:$16 sps:$4 sm:$0xff]   ;;  %v333_v19 = vsub.s32 3, %v320_v11 }
  0x8c   : > { %v3458_v1 = vld [vmem:[#allocation10 + $0xc8] ss:$16 sps:$4 sm:$0xff]   ;;  %v3464_v4 = vld [vmem:[#allocation10 + $0xec] ss:$16 sps:$4 sm:$0xff]   ;;  %v712_v7 = vld [vmem:[#allocation2] sm:$0xff]  ;;  %s2177_s13 = sshll.u32 %s3365_s27, 4  ;;  %s3641_s13 = int_to_ptr.vmem [resolvable:$true] %s2177_s13 }
  0x8d   : > { %534 = vmatpush1.bf16.msra.mxu0 %v2734_v24  ;;  %607 = vmatpush1.bf16.msra.mxu1 %v2735_v25  ;;  %v3470_v6 = vld [vmem:[#allocation10 + $0xe8] ss:$16 sps:$4 sm:$0xff]   ;;  %v317_v13 = vld [vmem:[%s3694_s3] sm:$0xf]  ;;  %s2161_s24 = scalar_lea.sflag [#allocation7], %s3351_s6  ;;  %s3038_s7 = scalar_lea.vmem %s3641_s13, 512 }
  0x8e   : > { %535 = vmatprep.subr.bf16.mxu0 %v2736_v26  ;;  %608 = vmatprep.subr.bf16.mxu1 %v2738_v27  ;;  %v713_v8 = vld [vmem:[#allocation2 + $0x8] sm:$0xff]  ;;  %v3517_v15 = vrot.slane %v317_v13, %v321_v12  ;;  %v3519_v16 = vrot.slane %v317_v13, %v325_v14  ;;  %v329_v27 = vsub.s32 2, %v320_v11  ;;  %p3039_p12 = scmp.ne.s32.totalorder %s3641_s13, %s3038_s7  ;;  %p3710_p1 = scmp.ne.s32.totalorder %s3706_s30, 0 }
  0x8f   : > { %v716_v9 = vpack.c.bf16 %v713_v8, %v712_v7  ;;  %s3135_s18 = smov [#allocation11]  }
  0x90   : > { %p3040_p10 = pnand %p3039_p12, %p3710_p1  ;;  %s3042_s28 = sshll.u32 %s3135_s18, 4  ;;  %s3043_s28 = int_to_ptr.vmem [resolvable:$false] %s3042_s28 }
  0x91   : > { %536 = vmatpush1.bf16.msra.mxu0 %v2740_v28  ;;  %609 = vmatpush1.bf16.msra.mxu1 %v2741_v29  ;;  %s3044_s8 = scalar_lea.vmem %s3043_s28, 1024  ;;  %p3045_p5 = scmp.lt.s32.totalorder %s3641_s13, %s3043_s28 }
  0x92   : > { %537 = vmatprep.subr.bf16.mxu0 %v2742_v30  ;;  %610 = vmatprep.subr.bf16.mxu1 %v2744_v31  ;;  %p3041_p3 = pneg %p3040_p10  ;;  %p3046_p9 = scmp.lt.s32.totalorder %s3044_s8, %s3038_s7 }
  0x94   : > { %p3047_p11 = por %p3046_p9, %p3045_p5 }
  0x95   : > { %538 = vmatpush1.bf16.msra.mxu0 %v2746_v32  ;;  %611 = vmatpush1.bf16.msra.mxu1 %v2747_v33  ;;  %v3524_v32 = vrot.slane %v317_v13, %v333_v19 }
  0x96   : > { %909 = vmatprep.subr.bf16.mxu0 %v3370_v34  ;;  %952 = vmatprep.subr.bf16.mxu1 %v3372_v35  ;;  %p3048_p0 = pnand %p3047_p11, %p3041_p3 }
  0x98   : > { %556 = vmatmul.mubr.bf16.vlgmr.msra.gmra.mrb[0].mxu0 %v2748_v36  ;;  %629 = vmatmul.mubr.bf16.vlgmr.msra.gmra.mrb[0].mxu1 %v2748_v36  ;;  %v3527_v36 = vrot.slane %v317_v13, %v329_v27 }
  0x99   : > { %910 = vmatpush1.bf16.msra.mxu0 %v3375_v37  ;;  %953 = vmatpush1.bf16.msra.mxu1 %v3377_v38 }
  0x9a   : > { %911 = vmatprep.subr.bf16.mxu0 %v3381_v39  ;;  %954 = vmatprep.subr.bf16.mxu1 %v3383_v40 }
  0x9b   : > { %565 = vmatprep.mubr.bf16.mxu0 %v3134_v3  ;;  %638 = vmatprep.mubr.bf16.mxu1 %v3134_v3 }
  0x9d   : > { %912 = vmatpush1.bf16.msra.mxu0 %v3385_v41  ;;  %955 = vmatpush1.bf16.msra.mxu1 %v3389_v42 }
  0x9e   : > { %913 = vmatprep.subr.bf16.mxu0 %v3393_v43  ;;  %956 = vmatprep.subr.bf16.mxu1 %v3395_v44 }
  0xa0   : > { %566 = vmatmul.mubr.bf16.gmra.mrb[4].mxu0 %v2761_v45  ;;  %639 = vmatmul.mubr.bf16.gmra.mrb[4].mxu1 %v2761_v45 }
  0xa1   : > { %914 = vmatpush1.bf16.msra.mxu0 %v3400_v46  ;;  %957 = vmatpush1.bf16.msra.mxu1 %v3402_v47 }
  0xa2   : > { %915 = vmatprep.subr.bf16.mxu0 %v3406_v48  ;;  %958 = vmatprep.subr.bf16.mxu1 %v3410_v49 }
  0xa3   : > { %575 = vmatprep.mubr.bf16.mxu0 %v3134_v3  ;;  %648 = vmatprep.mubr.bf16.mxu1 %v3134_v3 }
  0xa5   : > { %916 = vmatpush1.bf16.msra.mxu0 %v3412_v50  ;;  %959 = vmatpush1.bf16.msra.mxu1 %v3414_v51 }
  0xa6   : > { %917 = vmatprep.subr.bf16.mxu0 %v3418_v52  ;;  %960 = vmatprep.subr.bf16.mxu1 %v3422_v53 }
  0xa8   : > { %576 = vmatmul.mubr.bf16.gmra.mrb[8].mxu0 %v2774_v54  ;;  %649 = vmatmul.mubr.bf16.gmra.mrb[8].mxu1 %v2774_v54 }
  0xa9   : > { %918 = vmatpush1.bf16.msra.mxu0 %v3427_v55  ;;  %961 = vmatpush1.bf16.msra.mxu1 %v3429_v56 }
  0xaa   : > { %919 = vmatprep.subr.bf16.mxu0 %v3431_v57  ;;  %962 = vmatprep.subr.bf16.mxu1 %v3433_v58 }
  0xab   : > { %585 = vmatprep.mubr.bf16.mxu0 %v3134_v3  ;;  %658 = vmatprep.mubr.bf16.mxu1 %v3134_v3 }
  0xad   : > { %920 = vmatpush1.bf16.msra.mxu0 %v3439_v59  ;;  %963 = vmatpush1.bf16.msra.mxu1 %v3441_v60 }
  0xae   : > { %921 = vmatprep.subr.bf16.mxu0 %v3447_v61  ;;  %964 = vmatprep.subr.bf16.mxu1 %v3449_v62 }
  0xb0   : > { %586 = vmatmul.mubr.bf16.gmra.mrb[12].mxu0 %v2787_v63  ;;  %659 = vmatmul.mubr.bf16.gmra.mrb[12].mxu1 %v2787_v63 }
  0xb1   : > { %922 = vmatpush1.bf16.msra.mxu0 %v3456_v0  ;;  %965 = vmatpush1.bf16.msra.mxu1 %v3458_v1 }
  0xb2   : > { %923 = vmatprep.subr.bf16.mxu0 %v3462_v2  ;;  %966 = vmatprep.subr.bf16.mxu1 %v3464_v4 }
  0xb3   : > { %941 = vmatprep.mubr.bf16.mxu0 %v3134_v3  ;;  %984 = vmatprep.mubr.bf16.mxu1 %v3134_v3 }
  0xb5   : > { %924 = vmatpush1.bf16.msra.mxu0 %v3466_v5  ;;  %967 = vmatpush1.bf16.msra.mxu1 %v3470_v6 }
  0xb6   : > { %1273 = vmatprep.subr.bf16.mxu0 %v3370_v34  ;;  %1316 = vmatprep.subr.bf16.mxu1 %v3372_v35 }
  0xb8   : > { %942 = vmatmul.mubr.bf16.vlgmr.msra.gmra.mrb[0].mxu0 %v716_v9  ;;  %985 = vmatmul.mubr.bf16.vlgmr.msra.gmra.mrb[0].mxu1 %v716_v9 }
  0xb9   : > { %1274 = vmatpush1.bf16.msra.mxu0 %v3375_v37  ;;  %1317 = vmatpush1.bf16.msra.mxu1 %v3377_v38 }
  0xba   : > { %1275 = vmatprep.subr.bf16.mxu0 %v3381_v39  ;;  %1318 = vmatprep.subr.bf16.mxu1 %v3383_v40 }
  0xbb   : > { %1305 = vmatprep.mubr.bf16.mxu0 %v3134_v3  ;;  %1348 = vmatprep.mubr.bf16.mxu1 %v3134_v3 }
  0xbd   : > { %1276 = vmatpush1.bf16.msra.mxu0 %v3385_v41  ;;  %1319 = vmatpush1.bf16.msra.mxu1 %v3389_v42 }
  0xbe   : > { %1277 = vmatprep.subr.bf16.mxu0 %v3393_v43  ;;  %1320 = vmatprep.subr.bf16.mxu1 %v3395_v44 }
  0xc1   : > { %1278 = vmatpush1.bf16.msra.mxu0 %v3400_v46  ;;  %1321 = vmatpush1.bf16.msra.mxu1 %v3402_v47 }
  0xc2   : > { %1279 = vmatprep.subr.bf16.mxu0 %v3406_v48  ;;  %1322 = vmatprep.subr.bf16.mxu1 %v3410_v49 }
  0xc5   : > { %1280 = vmatpush1.bf16.msra.mxu0 %v3412_v50  ;;  %1323 = vmatpush1.bf16.msra.mxu1 %v3414_v51 }
  0xc6   : > { %1281 = vmatprep.subr.bf16.mxu0 %v3418_v52  ;;  %1324 = vmatprep.subr.bf16.mxu1 %v3422_v53 }
  0xc9   : > { %1282 = vmatpush1.bf16.msra.mxu0 %v3427_v55  ;;  %1325 = vmatpush1.bf16.msra.mxu1 %v3429_v56 }
  0xca   : > { %1283 = vmatprep.subr.bf16.mxu0 %v3431_v57  ;;  %1326 = vmatprep.subr.bf16.mxu1 %v3433_v58 }
  0xcd   : > { %1284 = vmatpush1.bf16.msra.mxu0 %v3439_v59  ;;  %1327 = vmatpush1.bf16.msra.mxu1 %v3441_v60 }
  0xce   : > { %1285 = vmatprep.subr.bf16.mxu0 %v3447_v61  ;;  %1328 = vmatprep.subr.bf16.mxu1 %v3449_v62 }
  0xd1   : > { %1286 = vmatpush1.bf16.msra.mxu0 %v3456_v0  ;;  %1329 = vmatpush1.bf16.msra.mxu1 %v3458_v1 }
  0xd2   : > { %1287 = vmatprep.subr.bf16.mxu0 %v3462_v2  ;;  %1330 = vmatprep.subr.bf16.mxu1 %v3464_v4 }
  0xd5   : > { %1288 = vmatpush1.bf16.msra.mxu0 %v3466_v5  ;;  %1331 = vmatpush1.bf16.msra.mxu1 %v3470_v6 }
  0xd6   : > { %1638 = vmatprep.subr.bf16.mxu0 %v3370_v34  ;;  %1681 = vmatprep.subr.bf16.mxu1 %v3372_v35 }
 0x18b   : > { %v943_v17 = vpop.f32.mrb[0].mxu0  ;;  %v986_v18 = vpop.f32.mrb[0].mxu1 }
 0x18c   : > { %v2545_v20 = vadd.f32 %v943_v17, %v3517_v15  ;;  %v945_v21 = vpop.f32.mrb[1].mxu0  ;;  %v988_v22 = vpop.f32.mrb[1].mxu1  ;;  %v2561_v54 = vadd.f32 %v986_v18, %v3527_v36 }
 0x18d   : > { %v2546_v23 = vadd.f32 %v945_v21, %v3519_v16  ;;  %v947_v24 = vpop.f32.mrb[2].mxu0  ;;  %v990_v25 = vpop.f32.mrb[2].mxu1  ;;  %v2562_v45 = vadd.f32 %v988_v22, %v3524_v32 }
 0x18e   : > { %v2370_v26 = vmul.f32 -1.442695, %v2545_v20  ;;  %v2547_v28 = vadd.f32 %v947_v24, %v3517_v15  ;;  %v949_v29 = vpop.f32.mrb[3].mxu0  ;;  %v992_v30 = vpop.f32.mrb[3].mxu1  ;;  %v2563_v8 = vadd.f32 %v990_v25, %v3527_v36 }
 0x18f   : > { %v2372_v31 = vmul.f32 -1.442695, %v2546_v23  ;;  %v2548_v33 = vadd.f32 %v949_v29, %v3519_v16  ;;  %v2374_v63 = vmul.f32 -1.442695, %v2562_v45  ;;  %v2564_v7 = vadd.f32 %v992_v30, %v3524_v32  ;;  %v714_v23 = vld [vmem:[#allocation3] sm:$0xff] }
 0x190   : > { %2824 = vpow2.f32 %v2370_v26  ;;  %v2371_v34 = vmul.f32 -1.442695, %v2547_v28 }
 0x191   : > { %2826 = vpow2.f32 %v2372_v31  ;;  %v2373_v35 = vmul.f32 -1.442695, %v2548_v33  ;;  %v2375_v12 = vmul.f32 -1.442695, %v2564_v7  ;;  %v715_v31 = vld [vmem:[#allocation3 + $0x8] sm:$0xff] }
 0x192   : > { %2828 = vpow2.f32 %v2371_v34 }
 0x193   : > { %2830 = vpow2.f32 %v2373_v35 }
 0x194   : > { %2832 = vtanh.f32 %v2561_v54 }
 0x195   : > { %2834 = vpow2.f32 %v2374_v63 }
 0x196   : > { %2836 = vtanh.f32 %v2563_v8 }
 0x19a   : > { %v2825_v9 = vpop.eup %2824 }
 0x19b   : > { %v2827_v10 = vpop.eup %2826  ;;  %v1009_v11 = vadd.f32 1.0, %v2825_v9 }
 0x19c   : > { %v1021_v14 = vadd.f32 1.0, %v2827_v10  ;;  %v2829_v13 = vpop.eup %2828 }
 0x19d   : > { %2838 = vrcp.f32 %v1009_v11  ;;  %v1010_v17 = vadd.f32 1.0, %v2829_v13  ;;  %v2831_v19 = vpop.eup %2830 }
 0x19e   : > { %2840 = vrcp.f32 %v1021_v14  ;;  %v1022_v18 = vadd.f32 1.0, %v2831_v19  ;;  %v2833_v20 = vpop.eup %2832 }
 0x19f   : > { %2842 = vpow2.f32 %v2375_v12  ;;  %v2835_v21 = vpop.eup %2834 }
 0x1a0   : > { %2844 = vrcp.f32 %v1010_v17  ;;  %v2837_v22 = vpop.eup %2836  ;;  %v1035_v30 = vadd.f32 1.0, %v2835_v21 }
 0x1a1   : > { %2846 = vrcp.f32 %v1022_v18 }
 0x1a2   : > { %2848 = vrcp.f32 %v1035_v30 }
 0x1a7   : > { %v2839_v24 = vpop.eup %2838 }
 0x1a8   : > { %v2841_v25 = vpop.eup %2840  ;;  %v1043_v26 = vmul.f32 %v2839_v24, %v2833_v20 }
 0x1a9   : > { %v2843_v27 = vpop.eup %2842  ;;  %v1041_v28 = vmul.f32 %v2841_v25, %v714_v23 }
 0x1aa   : > { %v2845_v29 = vpop.eup %2844  ;;  %v1036_v45 = vadd.f32 1.0, %v2843_v27 }
 0x1ab   : > { %v3533_v33 = vadd.f32 %v1043_v26, %v1041_v28  ;;  %v1044_v34 = vmul.f32 %v2845_v29, %v2837_v22  ;;  %v2847_v35 = vpop.eup %2846 }
 0x1ac   : > { %v1042_v54 = vmul.f32 %v2847_v35, %v715_v31  ;;  %v2849_v7 = vpop.eup %2848 }
 0x1ad   : > { %2850 = vtanh.f32 %v3533_v33 }
 0x1ae   : > { %v3536_v63 = vadd.f32 %v1044_v34, %v1042_v54  ;;  %2852 = vrcp.f32 %v1036_v45 }
 0x1b0   : > { %2854 = vtanh.f32 %v3536_v63 }
 0x1b7   : > { %v2851_v8 = vpop.eup %2850 }
 0x1b8   : > { %v2853_v9 = vpop.eup %2852  ;;  %v1049_v11 = vmul.f32 %v2851_v8, %v2849_v7 }
 0x1ba   : > { %v2855_v10 = vpop.eup %2854 }
 0x1bb   : > { %v1050_v12 = vmul.f32 %v2855_v10, %v2853_v9 }
 0x1bd   : > { %v2525_v14 = vpack.c.bf16 %v1050_v12, %v1049_v11 }
 0x1bf   : > { %2526 = vst [vmem:[%s3365_s27] sm:$0xff] %v2525_v14   ;;  %1306 = vmatmul.mubr.bf16.vlgmr.msra.gmra.mrb[4].mxu0 %v2525_v14  ;;  %1349 = vmatmul.mubr.bf16.vlgmr.msra.gmra.mrb[4].mxu1 %v2525_v14 }
 0x1c0   : > { %1639 = vmatpush1.bf16.msra.mxu0 %v3375_v37  ;;  %1682 = vmatpush1.bf16.msra.mxu1 %v3377_v38 }
 0x1c1   : > { %1640 = vmatprep.subr.bf16.mxu0 %v3381_v39  ;;  %1683 = vmatprep.subr.bf16.mxu1 %v3383_v40 }
 0x1c2   : > { %1670 = vmatprep.mubr.bf16.mxu0 %v3134_v3  ;;  %1713 = vmatprep.mubr.bf16.mxu1 %v3134_v3 }
 0x1c4   : > { %1641 = vmatpush1.bf16.msra.mxu0 %v3385_v41  ;;  %1684 = vmatpush1.bf16.msra.mxu1 %v3389_v42 }
 0x1c5   : > { %1642 = vmatprep.subr.bf16.mxu0 %v3393_v43  ;;  %1685 = vmatprep.subr.bf16.mxu1 %v3395_v44 }
 0x1c8   : > { %1643 = vmatpush1.bf16.msra.mxu0 %v3400_v46  ;;  %1686 = vmatpush1.bf16.msra.mxu1 %v3402_v47 }
 0x1c9   : > { %1644 = vmatprep.subr.bf16.mxu0 %v3406_v48  ;;  %1687 = vmatprep.subr.bf16.mxu1 %v3410_v49 }
 0x1cc   : > { %1645 = vmatpush1.bf16.msra.mxu0 %v3412_v50  ;;  %1688 = vmatpush1.bf16.msra.mxu1 %v3414_v51 }
 0x1cd   : > { %1646 = vmatprep.subr.bf16.mxu0 %v3418_v52  ;;  %1689 = vmatprep.subr.bf16.mxu1 %v3422_v53 }
 0x1d0   : > { %1647 = vmatpush1.bf16.msra.mxu0 %v3427_v55  ;;  %1690 = vmatpush1.bf16.msra.mxu1 %v3429_v56 }
 0x1d1   : > { %1648 = vmatprep.subr.bf16.mxu0 %v3431_v57  ;;  %1691 = vmatprep.subr.bf16.mxu1 %v3433_v58 }
 0x1d4   : > { %1649 = vmatpush1.bf16.msra.mxu0 %v3439_v59  ;;  %1692 = vmatpush1.bf16.msra.mxu1 %v3441_v60 }
 0x1d5   : > { %1650 = vmatprep.subr.bf16.mxu0 %v3447_v61  ;;  %1693 = vmatprep.subr.bf16.mxu1 %v3449_v62 }
 0x1d8   : > { %1651 = vmatpush1.bf16.msra.mxu0 %v3456_v0  ;;  %1694 = vmatpush1.bf16.msra.mxu1 %v3458_v1 }
 0x1d9   : > { %1652 = vmatprep.subr.bf16.mxu0 %v3462_v2  ;;  %1695 = vmatprep.subr.bf16.mxu1 %v3464_v4 }
 0x1dc   : > { %1653 = vmatpush1.bf16.msra.mxu0 %v3466_v5  ;;  %1696 = vmatpush1.bf16.msra.mxu1 %v3470_v6 }
 0x292   : > { %v1307_v37 = vpop.f32.mrb[4].mxu0  ;;  %v1350_v38 = vpop.f32.mrb[4].mxu1 }
 0x293   : > { %v2549_v39 = vadd.f32 %v1307_v37, %v3517_v15  ;;  %v1309_v40 = vpop.f32.mrb[5].mxu0  ;;  %v1352_v41 = vpop.f32.mrb[5].mxu1  ;;  %v2565_v18 = vadd.f32 %v1350_v38, %v3527_v36 }
 0x294   : > { %v2550_v42 = vadd.f32 %v1309_v40, %v3519_v16  ;;  %v1311_v43 = vpop.f32.mrb[6].mxu0  ;;  %v1354_v44 = vpop.f32.mrb[6].mxu1  ;;  %v2566_v19 = vadd.f32 %v1352_v41, %v3524_v32 }
 0x295   : > { %v2410_v46 = vmul.f32 -1.442695, %v2549_v39  ;;  %v2551_v47 = vadd.f32 %v1311_v43, %v3517_v15  ;;  %v1313_v48 = vpop.f32.mrb[7].mxu0  ;;  %v1356_v49 = vpop.f32.mrb[7].mxu1  ;;  %v2567_v22 = vadd.f32 %v1354_v44, %v3527_v36 }
 0x296   : > { %v2412_v50 = vmul.f32 -1.442695, %v2550_v42  ;;  %v2552_v51 = vadd.f32 %v1313_v48, %v3519_v16  ;;  %v2414_v20 = vmul.f32 -1.442695, %v2566_v19  ;;  %v2568_v21 = vadd.f32 %v1356_v49, %v3524_v32  ;;  %v2805_v49 = vld [vmem:[#allocation10 + $0xc] ss:$16 sps:$4 sm:$0xff]  }
 0x297   : > { %2856 = vpow2.f32 %v2410_v46  ;;  %v2411_v13 = vmul.f32 -1.442695, %v2551_v47  ;;  %2046 = vmatprep.subr.bf16.mxu1 %v2805_v49  ;;  %v2806_v19 = vld [vmem:[#allocation10 + $0x20] ss:$16 sps:$4 sm:$0xff]  }
 0x298   : > { %2858 = vpow2.f32 %v2412_v50  ;;  %v2413_v17 = vmul.f32 -1.442695, %v2552_v51  ;;  %v2415_v26 = vmul.f32 -1.442695, %v2568_v21  ;;  %v2800_v50 = vld [vmem:[#allocation10] ss:$16 sps:$4 sm:$0xff]  }
 0x299   : > { %2860 = vpow2.f32 %v2411_v13  ;;  %v2803_v51 = vld [vmem:[#allocation10 + $0x8] ss:$16 sps:$4 sm:$0xff]   ;;  %v2808_v13 = vld [vmem:[#allocation10 + $0x24] ss:$16 sps:$4 sm:$0xff]   ;;  %v2817_v21 = vld [vmem:[#allocation10 + $0x4c] ss:$16 sps:$4 sm:$0xff]  }
 0x29a   : > { %2862 = vpow2.f32 %v2413_v17  ;;  %v2811_v17 = vld [vmem:[#allocation10 + $0x2c] ss:$16 sps:$4 sm:$0xff]  }
 0x29b   : > { %2864 = vtanh.f32 %v2565_v18  ;;  %v2809_v18 = vld [vmem:[#allocation10 + $0x28] ss:$16 sps:$4 sm:$0xff]  }
 0x29c   : > { %2866 = vpow2.f32 %v2414_v20  ;;  %v2814_v20 = vld [vmem:[#allocation10 + $0x44] ss:$16 sps:$4 sm:$0xff]  }
 0x29d   : > { %2868 = vtanh.f32 %v2567_v22  ;;  %v2812_v22 = vld [vmem:[#allocation10 + $0x40] ss:$16 sps:$4 sm:$0xff]  }
 0x2a1   : > { %v2857_v23 = vpop.eup %2856 }
 0x2a2   : > { %v2859_v24 = vpop.eup %2858  ;;  %v1373_v25 = vadd.f32 1.0, %v2857_v23  ;;  %v2820_v23 = vld [vmem:[#allocation10 + $0x64] ss:$16 sps:$4 sm:$0xff]  }
 0x2a3   : > { %v1385_v27 = vadd.f32 1.0, %v2859_v24  ;;  %v2861_v28 = vpop.eup %2860  ;;  %v2823_v24 = vld [vmem:[#allocation10 + $0x6c] ss:$16 sps:$4 sm:$0xff]  }
 0x2a4   : > { %2870 = vrcp.f32 %v1373_v25  ;;  %v1374_v29 = vadd.f32 1.0, %v2861_v28  ;;  %v2863_v30 = vpop.eup %2862  ;;  %v2818_v25 = vld [vmem:[#allocation10 + $0x60] ss:$16 sps:$4 sm:$0xff]  }
 0x2a5   : > { %2872 = vrcp.f32 %v1385_v27  ;;  %v1386_v31 = vadd.f32 1.0, %v2863_v30  ;;  %v2865_v34 = vpop.eup %2864 }
 0x2a6   : > { %2874 = vpow2.f32 %v2415_v26  ;;  %v2867_v35 = vpop.eup %2866  ;;  %v2821_v26 = vld [vmem:[#allocation10 + $0x68] ss:$16 sps:$4 sm:$0xff]  }
 0x2a7   : > { %2876 = vrcp.f32 %v1374_v29  ;;  %v2869_v45 = vpop.eup %2868  ;;  %v1399_v12 = vadd.f32 1.0, %v2867_v35 }
 0x2a8   : > { %2878 = vrcp.f32 %v1386_v31 }
 0x2a9   : > { %2880 = vrcp.f32 %v1399_v12 }
 0x2ae   : > { %v2871_v54 = vpop.eup %2870 }
 0x2af   : > { %v2873_v7 = vpop.eup %2872  ;;  %v1407_v8 = vmul.f32 %v2871_v54, %v2865_v34 }
 0x2b0   : > { %v2875_v9 = vpop.eup %2874  ;;  %v1405_v10 = vmul.f32 %v2873_v7, %v3533_v33 }
 0x2b1   : > { %v2877_v11 = vpop.eup %2876  ;;  %v1400_v39 = vadd.f32 1.0, %v2875_v9 }
 0x2b2   : > { %v3581_v14 = vadd.f32 %v1407_v8, %v1405_v10  ;;  %v1408_v37 = vmul.f32 %v2877_v11, %v2869_v45  ;;  %v2879_v38 = vpop.eup %2878 }
 0x2b3   : > { %v1406_v40 = vmul.f32 %v2879_v38, %v3536_v63  ;;  %v2881_v42 = vpop.eup %2880  ;;  %v2802_v63 = vld [vmem:[#allocation10 + $0x4] ss:$16 sps:$4 sm:$0xff]  }
 0x2b4   : > { %2882 = vtanh.f32 %v3581_v14  ;;  %2003 = vmatprep.subr.bf16.mxu0 %v2802_v63 }
 0x2b5   : > { %v3585_v41 = vadd.f32 %v1408_v37, %v1406_v40  ;;  %2884 = vrcp.f32 %v1400_v39 }
 0x2b7   : > { %2886 = vtanh.f32 %v3585_v41 }
 0x2be   : > { %v2883_v33 = vpop.eup %2882 }
 0x2bf   : > { %v2885_v43 = vpop.eup %2884  ;;  %v1413_v46 = vmul.f32 %v2883_v33, %v2881_v42 }
 0x2c1   : > { %v2887_v44 = vpop.eup %2886 }
 0x2c2   : > { %v1414_v47 = vmul.f32 %v2887_v44, %v2885_v43 }
 0x2c4   : > { %v2530_v48 = vpack.c.bf16 %v1414_v47, %v1413_v46 }
 0x2c6   : > { %2542 = vst [vmem:[%s3365_s27 + $0x8] sm:$0xff] %v2530_v48   ;;  %1671 = vmatmul.mubr.bf16.vlgmr.msra.gmra.mrb[8].mxu0 %v2530_v48  ;;  %1714 = vmatmul.mubr.bf16.vlgmr.msra.gmra.mrb[8].mxu1 %v2530_v48 }
 0x2c7   : > { %2035 = vmatprep.mubr.bf16.mxu0 %v3134_v3  ;;  %2078 = vmatprep.mubr.bf16.mxu1 %v3134_v3  ;;  %v2815_v3 = vld [vmem:[#allocation10 + $0x48] ss:$16 sps:$4 sm:$0xff]  }
 0x2c8   : > { %2004 = vmatpush1.bf16.msra.mxu0 %v2800_v50  ;;  %2047 = vmatpush1.bf16.msra.mxu1 %v2803_v51 }
 0x2c9   : > { %2005 = vmatprep.subr.bf16.mxu0 %v2808_v13  ;;  %2048 = vmatprep.subr.bf16.mxu1 %v2811_v17 }
 0x2cc   : > { %2006 = vmatpush1.bf16.msra.mxu0 %v2806_v19  ;;  %2049 = vmatpush1.bf16.msra.mxu1 %v2809_v18 }
 0x2cd   : > { %2007 = vmatprep.subr.bf16.mxu0 %v2814_v20  ;;  %2050 = vmatprep.subr.bf16.mxu1 %v2817_v21 }
 0x2d0   : > { %2008 = vmatpush1.bf16.msra.mxu0 %v2812_v22  ;;  %2051 = vmatpush1.bf16.msra.mxu1 %v2815_v3 }
 0x2d1   : > { %2009 = vmatprep.subr.bf16.mxu0 %v2820_v23  ;;  %2052 = vmatprep.subr.bf16.mxu1 %v2823_v24 }
 0x2d4   : > { %2010 = vmatpush1.bf16.msra.mxu0 %v2818_v25  ;;  %2053 = vmatpush1.bf16.msra.mxu1 %v2821_v26 }
 0x2d5   : > { %2011 = vmatprep.subr.bf16.mxu0 %v3418_v52  ;;  %2054 = vmatprep.subr.bf16.mxu1 %v3422_v53 }
 0x2d8   : > { %2012 = vmatpush1.bf16.msra.mxu0 %v3427_v55  ;;  %2055 = vmatpush1.bf16.msra.mxu1 %v3429_v56 }
 0x2d9   : > { %2013 = vmatprep.subr.bf16.mxu0 %v3431_v57  ;;  %2056 = vmatprep.subr.bf16.mxu1 %v3433_v58 }
 0x2dc   : > { %2014 = vmatpush1.bf16.msra.mxu0 %v3439_v59  ;;  %2057 = vmatpush1.bf16.msra.mxu1 %v3441_v60 }
 0x2dd   : > { %2015 = vmatprep.subr.bf16.mxu0 %v3447_v61  ;;  %2058 = vmatprep.subr.bf16.mxu1 %v3449_v62 }
 0x2e0   : > { %2016 = vmatpush1.bf16.msra.mxu0 %v3456_v0  ;;  %2059 = vmatpush1.bf16.msra.mxu1 %v3458_v1 }
 0x2e1   : > { %2017 = vmatprep.subr.bf16.mxu0 %v3462_v2  ;;  %2060 = vmatprep.subr.bf16.mxu1 %v3464_v4 }
 0x2e4   : > { %2018 = vmatpush1.bf16.msra.mxu0 %v3466_v5  ;;  %2061 = vmatpush1.bf16.msra.mxu1 %v3470_v6 }
 0x399   : > { %v1672_v52 = vpop.f32.mrb[8].mxu0  ;;  %v1715_v53 = vpop.f32.mrb[8].mxu1 }
 0x39a   : > { %v2553_v55 = vadd.f32 %v1672_v52, %v3517_v15  ;;  %v1674_v56 = vpop.f32.mrb[9].mxu0  ;;  %v1717_v57 = vpop.f32.mrb[9].mxu1  ;;  %v2569_v28 = vadd.f32 %v1715_v53, %v3527_v36 }
 0x39b   : > { %v2554_v58 = vadd.f32 %v1674_v56, %v3519_v16  ;;  %v1676_v59 = vpop.f32.mrb[10].mxu0  ;;  %v1719_v60 = vpop.f32.mrb[10].mxu1  ;;  %v2570_v27 = vadd.f32 %v1717_v57, %v3524_v32 }
 0x39c   : > { %v2452_v61 = vmul.f32 -1.442695, %v2553_v55  ;;  %v2555_v62 = vadd.f32 %v1676_v59, %v3517_v15  ;;  %v1678_v0 = vpop.f32.mrb[11].mxu0  ;;  %v1721_v1 = vpop.f32.mrb[11].mxu1  ;;  %v2571_v31 = vadd.f32 %v1719_v60, %v3527_v36 }
 0x39d   : > { %v2454_v2 = vmul.f32 -1.442695, %v2554_v58  ;;  %v2556_v4 = vadd.f32 %v1678_v0, %v3519_v16  ;;  %v2456_v29 = vmul.f32 -1.442695, %v2570_v27  ;;  %v2572_v30 = vadd.f32 %v1721_v1, %v3524_v32 }
 0x39e   : > { %2888 = vpow2.f32 %v2452_v61  ;;  %v2453_v5 = vmul.f32 -1.442695, %v2555_v62 }
 0x39f   : > { %2890 = vpow2.f32 %v2454_v2  ;;  %v2455_v6 = vmul.f32 -1.442695, %v2556_v4  ;;  %v2457_v54 = vmul.f32 -1.442695, %v2572_v30 }
 0x3a0   : > { %2892 = vpow2.f32 %v2453_v5 }
 0x3a1   : > { %2894 = vpow2.f32 %v2455_v6 }
 0x3a2   : > { %2896 = vtanh.f32 %v2569_v28 }
 0x3a3   : > { %2898 = vpow2.f32 %v2456_v29 }
 0x3a4   : > { %2900 = vtanh.f32 %v2571_v31 }
 0x3a8   : > { %v2889_v34 = vpop.eup %2888 }
 0x3a9   : > { %v2891_v35 = vpop.eup %2890  ;;  %v1738_v45 = vadd.f32 1.0, %v2889_v34 }
 0x3aa   : > { %v1750_v7 = vadd.f32 1.0, %v2891_v35  ;;  %v2893_v8 = vpop.eup %2892 }
 0x3ab   : > { %2902 = vrcp.f32 %v1738_v45  ;;  %v1739_v9 = vadd.f32 1.0, %v2893_v8  ;;  %v2895_v10 = vpop.eup %2894 }
 0x3ac   : > { %2904 = vrcp.f32 %v1750_v7  ;;  %v1751_v11 = vadd.f32 1.0, %v2895_v10  ;;  %v2897_v12 = vpop.eup %2896 }
 0x3ad   : > { %2906 = vpow2.f32 %v2457_v54  ;;  %v2899_v37 = vpop.eup %2898 }
 0x3ae   : > { %2908 = vrcp.f32 %v1739_v9  ;;  %v2901_v38 = vpop.eup %2900  ;;  %v1764_v46 = vadd.f32 1.0, %v2899_v37 }
 0x3af   : > { %2910 = vrcp.f32 %v1751_v11 }
 0x3b0   : > { %2912 = vrcp.f32 %v1764_v46 }
 0x3b5   : > { %v2903_v39 = vpop.eup %2902 }
 0x3b6   : > { %v2905_v40 = vpop.eup %2904  ;;  %v1772_v42 = vmul.f32 %v2903_v39, %v2897_v12 }
 0x3b7   : > { %v2907_v33 = vpop.eup %2906  ;;  %v1770_v43 = vmul.f32 %v2905_v40, %v3581_v14 }
 0x3b8   : > { %v2909_v44 = vpop.eup %2908  ;;  %v1765_v49 = vadd.f32 1.0, %v2907_v33 }
 0x3b9   : > { %v3616_v47 = vadd.f32 %v1772_v42, %v1770_v43  ;;  %v1773_v48 = vmul.f32 %v2909_v44, %v2901_v38  ;;  %v2911_v63 = vpop.eup %2910 }
 0x3ba   : > { %v1771_v50 = vmul.f32 %v2911_v63, %v3585_v41  ;;  %v2913_v13 = vpop.eup %2912 }
 0x3bb   : > { %2914 = vtanh.f32 %v3616_v47 }
 0x3bc   : > { %v3620_v51 = vadd.f32 %v1773_v48, %v1771_v50  ;;  %2916 = vrcp.f32 %v1765_v49 }
 0x3be   : > { %2918 = vtanh.f32 %v3620_v51 }
 0x3c5   : > { %v2915_v14 = vpop.eup %2914 }
 0x3c6   : > { %v2917_v17 = vpop.eup %2916  ;;  %v1778_v18 = vmul.f32 %v2915_v14, %v2913_v13 }
 0x3c8   : > { %v2919_v19 = vpop.eup %2918 }
 0x3c9   : > { %v1779_v20 = vmul.f32 %v2919_v19, %v2917_v17 }
 0x3cb   : > { %v2535_v21 = vpack.c.bf16 %v1779_v20, %v1778_v18 }
 0x3cd   : > { %2543 = vst [vmem:[%s3365_s27 + $0x10] sm:$0xff] %v2535_v21   ;;  %2036 = vmatmul.mubr.bf16.vlgmr.msra.gmra.mrb[12].mxu0 %v2535_v21  ;;  %2079 = vmatmul.mubr.bf16.vlgmr.msra.gmra.mrb[12].mxu1 %v2535_v21 }
 0x4a0   : > { %v2037_v22 = vpop.f32.mrb[12].mxu0  ;;  %v2080_v41 = vpop.f32.mrb[12].mxu1 }
 0x4a1   : > { %v2557_v3 = vadd.f32 %v2037_v22, %v3517_v15  ;;  %v2039_v23 = vpop.f32.mrb[13].mxu0  ;;  %v2082_v24 = vpop.f32.mrb[13].mxu1  ;;  %v2573_v0 = vadd.f32 %v2080_v41, %v3527_v36 }
 0x4a2   : > { %v2558_v25 = vadd.f32 %v2039_v23, %v3519_v16  ;;  %v2041_v26 = vpop.f32.mrb[14].mxu0  ;;  %v2084_v52 = vpop.f32.mrb[14].mxu1  ;;  %v2574_v62 = vadd.f32 %v2082_v24, %v3524_v32 }
 0x4a3   : > { %v2494_v53 = vmul.f32 -1.442695, %v2557_v3  ;;  %v2559_v55 = vadd.f32 %v2041_v26, %v3517_v15  ;;  %v2043_v56 = vpop.f32.mrb[15].mxu0  ;;  %v2086_v57 = vpop.f32.mrb[15].mxu1  ;;  %v2575_v15 = vadd.f32 %v2084_v52, %v3527_v36 }
 0x4a4   : > { %v2496_v58 = vmul.f32 -1.442695, %v2558_v25  ;;  %v2560_v59 = vadd.f32 %v2043_v56, %v3519_v16  ;;  %v2498_v1 = vmul.f32 -1.442695, %v2574_v62  ;;  %v2576_v2 = vadd.f32 %v2086_v57, %v3524_v32 }
 0x4a5   : > { %2920 = vpow2.f32 %v2494_v53  ;;  %v2495_v60 = vmul.f32 -1.442695, %v2559_v55 }
 0x4a6   : > { %2922 = vpow2.f32 %v2496_v58  ;;  %v2497_v61 = vmul.f32 -1.442695, %v2560_v59  ;;  %v2499_v16 = vmul.f32 -1.442695, %v2576_v2 }
 0x4a7   : > { %2924 = vpow2.f32 %v2495_v60 }
 0x4a8   : > { %2926 = vpow2.f32 %v2497_v61 }
 0x4a9   : > { %2928 = vtanh.f32 %v2573_v0 }
 0x4aa   : > { %2930 = vpow2.f32 %v2498_v1 }
 0x4ab   : > { %2932 = vtanh.f32 %v2575_v15 }
 0x4af   : > { %v2921_v4 = vpop.eup %2920 }
 0x4b0   : > { %v2923_v5 = vpop.eup %2922  ;;  %v2103_v6 = vadd.f32 1.0, %v2921_v4 }
 0x4b1   : > { %v2115_v27 = vadd.f32 1.0, %v2923_v5  ;;  %v2925_v28 = vpop.eup %2924 }
 0x4b2   : > { %2934 = vrcp.f32 %v2103_v6  ;;  %v2104_v29 = vadd.f32 1.0, %v2925_v28  ;;  %v2927_v30 = vpop.eup %2926 }
 0x4b3   : > { %2936 = vrcp.f32 %v2115_v27  ;;  %v2116_v31 = vadd.f32 1.0, %v2927_v30  ;;  %v2929_v32 = vpop.eup %2928 }
 0x4b4   : > { %2938 = vpow2.f32 %v2499_v16  ;;  %v2931_v34 = vpop.eup %2930 }
 0x4b5   : > { %2940 = vrcp.f32 %v2104_v29  ;;  %v2933_v36 = vpop.eup %2932  ;;  %v2129_v7 = vadd.f32 1.0, %v2931_v34 }
 0x4b6   : > { %2942 = vrcp.f32 %v2116_v31 }
 0x4b7   : > { %2944 = vrcp.f32 %v2129_v7 }
 0x4bc   : > { %v2935_v35 = vpop.eup %2934 }
 0x4bd   : > { %v2937_v45 = vpop.eup %2936  ;;  %v2137_v54 = vmul.f32 %v2935_v35, %v2929_v32 }
 0x4be   : > { %v2939_v8 = vpop.eup %2938  ;;  %v2135_v9 = vmul.f32 %v2937_v45, %v3616_v47 }
 0x4bf   : > { %v2941_v10 = vpop.eup %2940  ;;  %v2130_v38 = vadd.f32 1.0, %v2939_v8 }
 0x4c0   : > { %v2139_v11 = vadd.f32 %v2137_v54, %v2135_v9  ;;  %v2138_v12 = vmul.f32 %v2941_v10, %v2933_v36  ;;  %v2943_v37 = vpop.eup %2942 }
 0x4c1   : > { %v2136_v39 = vmul.f32 %v2943_v37, %v3620_v51  ;;  %v2945_v42 = vpop.eup %2944 }
 0x4c2   : > { %2946 = vtanh.f32 %v2139_v11  ;;  %2147 = vst [vmem:[#allocation3] sm:$0xff] %v2139_v11 }
 0x4c3   : > { %v2140_v40 = vadd.f32 %v2138_v12, %v2136_v39  ;;  %2948 = vrcp.f32 %v2130_v38 }
 0x4c5   : > { %2950 = vtanh.f32 %v2140_v40  ;;  %2148 = vst [vmem:[#allocation3 + $0x8] sm:$0xff] %v2140_v40 }
 0x4cc   : > { %v2947_v33 = vpop.eup %2946 }
 0x4cd   : > { %v2143_v43 = vmul.f32 %v2947_v33, %v2945_v42  ;;  %v2949_v44 = vpop.eup %2948 }
 0x4cf   : > { %2145 = vst [vmem:[#allocation2] sm:$0xff] %v2143_v43  ;;  %v2951_v46 = vpop.eup %2950 }
 0x4d0   : > { %v2144_v47 = vmul.f32 %v2951_v46, %v2949_v44 }
 0x4d2   : > { %2146 = vst [vmem:[#allocation2 + $0x8] sm:$0xff] %v2144_v47  ;;  %v2540_v48 = vpack.c.bf16 %v2144_v47, %v2143_v43 }
 0x4d4   : > { %2544 = vst [vmem:[%s3365_s27 + $0x18] sm:$0xff] %v2540_v48  }
 0x4d5   : > { %3051 = shalt.err (!%p3048_p0)
}
 0x4d6   : > { %s3052_s21 = scalar_lea.hbm %s3639_s11, 512  ;;  %s3056_s27 = scalar_lea.hbm %s3695_s4, 1024 }
 0x4d7   : > { %p3053_p4 = scmp.ne.s32.totalorder %s3639_s11, %s3052_s21  ;;  %p3057_p7 = scmp.lt.u32.totalorder %s3639_s11, %s3695_s4 }
 0x4d8   : > { %p3058_p2 = scmp.lt.u32.totalorder %s3056_s27, %s3052_s21  ;;  %p3060_p12 = scmp.lt.u32.totalorder %s3052_s21, %s3639_s11 }
 0x4d9   : > { %p3054_p13 = pnand %p3053_p4, %p3710_p1 }
 0x4da   : > { %p3059_p8 = por %p3058_p2, %p3057_p7 }
 0x4db   : > { %p3055_p6 = pneg %p3054_p13 }
 0x4dc   : > { %p3061_p10 = por %p3060_p12, %p3059_p8 }
 0x4de   : > { %p3062_p3 = pnand %p3061_p10, %p3055_p6 }
 0x4e0   : > { %3065 = shalt.err (!%p3062_p3)
}
 0x4e1   : > { %s3136_s12 = smov 64   ;;  %s3137_s29 = smov 4  }
 0x4e2   : > { %2619 = dma.vmem_to_hbm [thread:$0]  (%p3710_p1), %s3641_s13, 512, %s3639_s11, %s2161_s24, %s3136_s12, %s3136_s12, %s3137_s29  }
 0x4e3 PF: > { %s2192_s14 = sand.u32 1, %s3104_s15   ;;  %p3711_p5 = scmp.ne.s32.totalorder %s3703_s26, 0 }
 0x4e4   : > { %p3712_p9 = scmp.ge.s32.totalorder %s3124_s20, 2  ;;  %s2193_s7 = scalar_lea.sflag [#allocation7], %s2192_s14 }
 0x4e6   : > { %p2633_p11 = pnand %p3712_p9, %p3711_p5 }
 0x4e8   : > { %3099 = dma.done.wait (!%p2633_p11), %s2193_s7, 512  }
 0x4e9   : > { %3101 = vsyncadd (!%p2633_p11), %s2193_s7, 4294966784  ;;  %s21_s20 = sadd.s32 1, %s3124_s20   ;;  %s3713_s15 = smov %s3108_s16 }
 0x4ea   : > { %p18_p0 = scmp.ge.s32.totalorder %s21_s20, 4   ;;  %s3714_s16 = smov %s3112_s17 }
 0x4eb   : > { %s3715_s17 = smov %s3305_s22  ;;  %s3716_s18 = smov %s3120_s19 }
 0x4ec   : > { %s3717_s19 = smov %s3719_s5  ;;  %20 = sbr.rel (!%p18_p0) target bundleno = 7 (0x7), region = 100 }
 0x4f3   :  { %2198 = vsyncpa [#allocation6], 1 }
 0x4f4   :  { %2200 = vsyncpa [#allocation6 + $0x1], 1 }
 0x4f5   :  { %2201 = vsyncpa [#allocation9], 1 }
 0x4f6   :  { %2202 = vsyncpa [#allocation7], 1 }
 0x4f7   :  { %2204 = vsyncpa [#allocation7 + $0x1], 1 }

</bundles_post_ra>
